<compile_context>
chip_gen: v7x
topology: tpu7x:2x2x1
jax: 0.10.0
libtpu: 0.0.40
codegen_flags: <defaults>
</compile_context>

<pallas_src>
import jax
import jax.numpy as jnp
from jax.experimental import pallas as pl
from jax.experimental.pallas import tpu as pltpu


def _round_up(n, m):
    return ((n + m - 1) // m) * m


def _pack_params(params, dtype=jnp.float32):
    """Pack w1..w4 / b1..b4 into one (rows, Wmax) slab.

    Layout (all weight row starts are 8-aligned so static in-kernel slices
    are cheap):
      rows 0..7 : b1..b4, one bias per row, zero-padded to Wmax lanes
      rows 8..  : w1, w2, w3, w4 stacked; each weight's rows padded to a
                  multiple of 8 and lanes zero-padded to Wmax.
    Returns (slab, (row_off_w1..w4), Wmax).
    """
    ws = [jnp.asarray(params[f"w{i}"], dtype) for i in (1, 2, 3, 4)]
    bs = [jnp.asarray(params[f"b{i}"], dtype) for i in (1, 2, 3, 4)]
    wmax = max(int(w.shape[1]) for w in ws)

    bias_block = jnp.zeros((8, wmax), dtype)
    for i, b in enumerate(bs):
        bias_block = bias_block.at[i, : b.shape[0]].set(b)

    blocks = [bias_block]
    offsets = []
    row = 8
    for w in ws:
        fi, fo = int(w.shape[0]), int(w.shape[1])
        fi_pad = _round_up(fi, 8)
        blk = jnp.zeros((fi_pad, wmax), dtype)
        blk = blk.at[:fi, :fo].set(w)
        blocks.append(blk)
        offsets.append(row)
        row += fi_pad

    slab = jnp.concatenate(blocks, axis=0)
    return slab, tuple(offsets), wmax


def extension_feedforward(x, params, ncuisines, ntastes, *, tile_b=8192):
    """Fused MLP forward.

    x: any shape whose trailing dims flatten to (ncuisines + ntastes); viewed
       as (-1, ncuisines + ntastes) exactly as in the PyTorch forward.
    params: dict with pre-transposed weights w1..w4 ([in, out]) and biases b1..b4.
    Returns (output, hidden2, rep) as float32, matching the PyTorch module.
    """
    d_in = ncuisines + ntastes
    x2d = jnp.asarray(x, jnp.float32).reshape(-1, d_in)
    B = x2d.shape[0]

    rep_size = int(params["w1"].shape[1])
    hidden_size = int(params["w3"].shape[1])
    out_size = int(params["w4"].shape[1])

    # --- batch tiling -----------------------------------------------------
    # Large tiles amortize per-grid-step overhead; cap at 8192 so double-
    # buffered f32 input + 3 output tiles (~6 MiB) fit v5e's 16 MiB scoped
    # VMEM default (v6e/v7x have more headroom).
    tile_b = max(16, min(int(tile_b), 8192))
    tile_b -= tile_b % 16
    # Guarantee >= 2 grid steps whenever the batch allows it so the
    # ("parallel",) batch axis is shared across v7x's 2 TensorCores.
    half = _round_up(max(1, (B + 1) // 2), 16)
    tile_b = max(16, min(tile_b, half))
    Bp = _round_up(B, tile_b)
    if Bp != B:
        # Pad only when required; padded rows are sliced off after the call.
        x2d = jnp.pad(x2d, ((0, Bp - B), (0, 0)))

    slab, (o1, o2, o3, o4), _ = _pack_params(params)

    def kernel(x_ref, p_ref, out_ref, h2_ref, rep_ref):
        x_t = x_ref[...]                                  # (tile_b, d_in) f32

        w1 = p_ref[o1:o1 + d_in, 0:rep_size]
        b1 = p_ref[0:1, 0:rep_size]
        rep = jnp.maximum(
            jnp.dot(x_t, w1, preferred_element_type=jnp.float32) + b1, 0.0)

        w2 = p_ref[o2:o2 + rep_size, 0:hidden_size]
        b2 = p_ref[1:2, 0:hidden_size]
        hidden = jnp.maximum(
            jnp.dot(rep, w2, preferred_element_type=jnp.float32) + b2, 0.0)

        w3 = p_ref[o3:o3 + hidden_size, 0:hidden_size]
        b3 = p_ref[2:3, 0:hidden_size]
        hidden2 = jnp.maximum(
            jnp.dot(hidden, w3, preferred_element_type=jnp.float32) + b3, 0.0)

        w4 = p_ref[o4:o4 + hidden_size, 0:out_size]
        b4 = p_ref[3:4, 0:out_size]
        logits = jnp.dot(hidden2, w4, preferred_element_type=jnp.float32) + b4

        out_ref[...] = jax.nn.sigmoid(logits)
        h2_ref[...] = hidden2
        rep_ref[...] = rep

    grid = (Bp // tile_b,)
    output, hidden2, rep = pl.pallas_call(
        kernel,
        out_shape=(
            jax.ShapeDtypeStruct((Bp, out_size), jnp.float32),
            jax.ShapeDtypeStruct((Bp, hidden_size), jnp.float32),
            jax.ShapeDtypeStruct((Bp, rep_size), jnp.float32),
        ),
        grid=grid,
        in_specs=[
            # batch tile of the input, pipelined / double-buffered
            pl.BlockSpec((tile_b, d_in), lambda i: (i, 0)),
            # single packed weight+bias slab, VMEM-resident across the grid
            pl.BlockSpec(slab.shape, lambda i: (0, 0)),
        ],
        out_specs=(
            pl.BlockSpec((tile_b, out_size), lambda i: (i, 0)),
            pl.BlockSpec((tile_b, hidden_size), lambda i: (i, 0)),
            pl.BlockSpec((tile_b, rep_size), lambda i: (i, 0)),
        ),
        compiler_params=pltpu.CompilerParams(
            dimension_semantics=("parallel",)),
    )(x2d, slab)

    if Bp != B:
        output, hidden2, rep = output[:B], hidden2[:B], rep[:B]
    return output, hidden2, rep


def init_params(key, rep_size, hidden_size, ncuisines, ntastes, output_shape):
    """Deterministic parameter init (PyTorch-style uniform(-1/sqrt(fan_in), +))."""
    d_in = ncuisines + ntastes
    dims = [(d_in, rep_size), (rep_size, hidden_size),
            (hidden_size, hidden_size), (hidden_size, output_shape)]
    params = {}
    keys = jax.random.split(key, 2 * len(dims))
    for i, (fan_in, fan_out) in enumerate(dims):
        bound = 1.0 / jnp.sqrt(jnp.float32(fan_in))
        # stored pre-transposed: [in, out]
        params[f"w{i+1}"] = jax.random.uniform(
            keys[2 * i], (fan_in, fan_out), jnp.float32, -bound, bound)
        params[f"b{i+1}"] = jax.random.uniform(
            keys[2 * i + 1], (fan_out,), jnp.float32, -bound, bound)
    return params


if __name__ == "__main__":
    # Small shapes consistent with the module.
    ncuisines = 10
    ntastes = 6
    rep_size = 32
    hidden_size = 32
    output_shape = 8
    batch = 1000  # not tile-aligned -> exercises padding + the 2-step grid

    key = jax.random.PRNGKey(0)
    pkey, xkey = jax.random.split(key)
    params = init_params(pkey, rep_size, hidden_size, ncuisines, ntastes,
                         output_shape)

    x = jax.random.normal(xkey, (batch, ncuisines + ntastes), jnp.float32)

    output, hidden2, rep = extension_feedforward(x, params, ncuisines, ntastes)
    jax.block_until_ready((output, hidden2, rep))

    # Full-f32 PyTorch-equivalent reference (highest matmul precision).
    hp = jax.lax.Precision.HIGHEST

    def ref_f32(xx):
        x2 = xx.reshape(-1, ncuisines + ntastes)
        r = jnp.maximum(jnp.dot(x2, params["w1"], precision=hp) + params["b1"], 0.0)
        h = jnp.maximum(jnp.dot(r, params["w2"], precision=hp) + params["b2"], 0.0)
        h2 = jnp.maximum(jnp.dot(h, params["w3"], precision=hp) + params["b3"], 0.0)
        o = jax.nn.sigmoid(jnp.dot(h2, params["w4"], precision=hp) + params["b4"])
        return o, h2, r

    o_f, h2_f, r_f = ref_f32(x)

    assert output.shape == (batch, output_shape)
    assert hidden2.shape == (batch, hidden_size)
    assert rep.shape == (batch, rep_size)
    # Tolerance leaves margin in case the in-kernel f32 MXU matmul uses a
    # reduced-precision pass on some generations; typically it matches ~1e-6.
    assert jnp.allclose(output, o_f, atol=2e-2)
    assert jnp.allclose(hidden2, h2_f, atol=2e-2)
    assert jnp.allclose(rep, r_f, atol=2e-2)

    print("KERNEL_OK")
</pallas_src>

<mosaic_0001>
module attributes {stable_mosaic.version = 11 : i64} {
  func.func @kernel(%arg0: i32, %arg1: memref<512x16xf32, #tpu.memory_space<vmem>>, %arg2: memref<120x32xf32, #tpu.memory_space<vmem>>, %arg3: memref<512x8xf32, #tpu.memory_space<vmem>>, %arg4: memref<512x32xf32, #tpu.memory_space<vmem>>, %arg5: memref<512x32xf32, #tpu.memory_space<vmem>>) attributes {dimension_semantics = [#tpu.dimension_semantics<parallel>], iteration_bounds = array<i64: 2>, scalar_prefetch = 0 : i64, scratch_operands = 0 : i64, tpu.core_type = #tpu.core_type<tc>, window_params = [{transform_indices = @transform_0, window_bounds = array<i64: 512, 16>}, {pipeline_mode = #tpu.pipeline_mode<synchronous>, transform_indices = @transform_1, window_bounds = array<i64: 120, 32>}, {transform_indices = @transform_2, window_bounds = array<i64: 512, 8>}, {transform_indices = @transform_3, window_bounds = array<i64: 512, 32>}, {transform_indices = @transform_4, window_bounds = array<i64: 512, 32>}]} {
    %c0 = arith.constant 0 : index
    %c0_0 = arith.constant 0 : index
    %0 = vector.load %arg1[%c0, %c0_0] : memref<512x16xf32, #tpu.memory_space<vmem>>, vector<512x16xf32>
    %c8 = arith.constant 8 : index
    %c0_1 = arith.constant 0 : index
    %1 = vector.load %arg2[%c8, %c0_1] : memref<120x32xf32, #tpu.memory_space<vmem>>, vector<16x32xf32>
    %c0_2 = arith.constant 0 : index
    %c0_3 = arith.constant 0 : index
    %2 = vector.load %arg2[%c0_2, %c0_3] : memref<120x32xf32, #tpu.memory_space<vmem>>, vector<1x32xf32>
    %cst = arith.constant dense<0.000000e+00> : vector<512x32xf32>
    %3 = tpu.matmul %0, %1, %cst {dimension_numbers = #tpu.dot_dimension_numbers<[1], [0], [0], [1], [0, 0, 1, 1], [], []>} : vector<512x16xf32>, vector<16x32xf32>, vector<512x32xf32> -> vector<512x32xf32>
    %4 = vector.broadcast %2 : vector<1x32xf32> to vector<512x32xf32>
    %5 = arith.addf %3, %4 : vector<512x32xf32>
    %cst_4 = arith.constant 0.000000e+00 : f32
    %6 = vector.broadcast %cst_4 : f32 to vector<512x32xf32>
    %7 = arith.maximumf %5, %6 : vector<512x32xf32>
    %c24 = arith.constant 24 : index
    %c0_5 = arith.constant 0 : index
    %8 = vector.load %arg2[%c24, %c0_5] : memref<120x32xf32, #tpu.memory_space<vmem>>, vector<32x32xf32>
    %c1 = arith.constant 1 : index
    %c0_6 = arith.constant 0 : index
    %9 = vector.load %arg2[%c1, %c0_6] : memref<120x32xf32, #tpu.memory_space<vmem>>, vector<1x32xf32>
    %cst_7 = arith.constant dense<0.000000e+00> : vector<512x32xf32>
    %10 = tpu.matmul %7, %8, %cst_7 {dimension_numbers = #tpu.dot_dimension_numbers<[1], [0], [0], [1], [0, 0, 1, 1], [], []>} : vector<512x32xf32>, vector<32x32xf32>, vector<512x32xf32> -> vector<512x32xf32>
    %11 = vector.broadcast %9 : vector<1x32xf32> to vector<512x32xf32>
    %12 = arith.addf %10, %11 : vector<512x32xf32>
    %cst_8 = arith.constant 0.000000e+00 : f32
    %13 = vector.broadcast %cst_8 : f32 to vector<512x32xf32>
    %14 = arith.maximumf %12, %13 : vector<512x32xf32>
    %c56 = arith.constant 56 : index
    %c0_9 = arith.constant 0 : index
    %15 = vector.load %arg2[%c56, %c0_9] : memref<120x32xf32, #tpu.memory_space<vmem>>, vector<32x32xf32>
    %c2 = arith.constant 2 : index
    %c0_10 = arith.constant 0 : index
    %16 = vector.load %arg2[%c2, %c0_10] : memref<120x32xf32, #tpu.memory_space<vmem>>, vector<1x32xf32>
    %cst_11 = arith.constant dense<0.000000e+00> : vector<512x32xf32>
    %17 = tpu.matmul %14, %15, %cst_11 {dimension_numbers = #tpu.dot_dimension_numbers<[1], [0], [0], [1], [0, 0, 1, 1], [], []>} : vector<512x32xf32>, vector<32x32xf32>, vector<512x32xf32> -> vector<512x32xf32>
    %18 = vector.broadcast %16 : vector<1x32xf32> to vector<512x32xf32>
    %19 = arith.addf %17, %18 : vector<512x32xf32>
    %cst_12 = arith.constant 0.000000e+00 : f32
    %20 = vector.broadcast %cst_12 : f32 to vector<512x32xf32>
    %21 = arith.maximumf %19, %20 : vector<512x32xf32>
    %c88 = arith.constant 88 : index
    %c0_13 = arith.constant 0 : index
    %22 = vector.load %arg2[%c88, %c0_13] : memref<120x32xf32, #tpu.memory_space<vmem>>, vector<32x8xf32>
    %c3 = arith.constant 3 : index
    %c0_14 = arith.constant 0 : index
    %23 = vector.load %arg2[%c3, %c0_14] : memref<120x32xf32, #tpu.memory_space<vmem>>, vector<1x8xf32>
    %cst_15 = arith.constant dense<0.000000e+00> : vector<512x8xf32>
    %24 = tpu.matmul %21, %22, %cst_15 {dimension_numbers = #tpu.dot_dimension_numbers<[1], [0], [0], [1], [0, 0, 1, 1], [], []>} : vector<512x32xf32>, vector<32x8xf32>, vector<512x8xf32> -> vector<512x8xf32>
    %25 = vector.broadcast %23 : vector<1x8xf32> to vector<512x8xf32>
    %26 = arith.addf %24, %25 : vector<512x8xf32>
    %27 = arith.negf %26 : vector<512x8xf32>
    %28 = math.exp %27 : vector<512x8xf32>
    %cst_16 = arith.constant 1.000000e+00 : f32
    %29 = vector.broadcast %cst_16 : f32 to vector<512x8xf32>
    %30 = arith.addf %29, %28 : vector<512x8xf32>
    %31 = arith.divf %29, %30 : vector<512x8xf32>
    %c0_17 = arith.constant 0 : index
    %c0_18 = arith.constant 0 : index
    %32 = vector.load %arg3[%c0_17, %c0_18] : memref<512x8xf32, #tpu.memory_space<vmem>>, vector<512x8xf32>
    tpu.vector_store %arg3[%c0_17, %c0_18], %31 {strides = array<i32>} : memref<512x8xf32, #tpu.memory_space<vmem>>, vector<512x8xf32>,
    %c0_19 = arith.constant 0 : index
    %c0_20 = arith.constant 0 : index
    %33 = vector.load %arg4[%c0_19, %c0_20] : memref<512x32xf32, #tpu.memory_space<vmem>>, vector<512x32xf32>
    tpu.vector_store %arg4[%c0_19, %c0_20], %21 {strides = array<i32>} : memref<512x32xf32, #tpu.memory_space<vmem>>, vector<512x32xf32>,
    %c0_21 = arith.constant 0 : index
    %c0_22 = arith.constant 0 : index
    %34 = vector.load %arg5[%c0_21, %c0_22] : memref<512x32xf32, #tpu.memory_space<vmem>>, vector<512x32xf32>
    tpu.vector_store %arg5[%c0_21, %c0_22], %7 {strides = array<i32>} : memref<512x32xf32, #tpu.memory_space<vmem>>, vector<512x32xf32>,
    return
  }
  func.func @transform_0(%arg0: i32) -> (i32, i32) {
    %c0_i32 = arith.constant 0 : i32
    %c0_i32_0 = arith.constant 0 : i32
    return %arg0, %c0_i32 : i32, i32
  }
  func.func @transform_1(%arg0: i32) -> (i32, i32) {
    %c0_i32 = arith.constant 0 : i32
    %c0_i32_0 = arith.constant 0 : i32
    %c0_i32_1 = arith.constant 0 : i32
    return %c0_i32, %c0_i32_0 : i32, i32
  }
  func.func @transform_2(%arg0: i32) -> (i32, i32) {
    %c0_i32 = arith.constant 0 : i32
    %c0_i32_0 = arith.constant 0 : i32
    return %arg0, %c0_i32 : i32, i32
  }
  func.func @transform_3(%arg0: i32) -> (i32, i32) {
    %c0_i32 = arith.constant 0 : i32
    %c0_i32_0 = arith.constant 0 : i32
    return %arg0, %c0_i32 : i32, i32
  }
  func.func @transform_4(%arg0: i32) -> (i32, i32) {
    %c0_i32 = arith.constant 0 : i32
    %c0_i32_0 = arith.constant 0 : i32
    return %arg0, %c0_i32 : i32, i32
  }
}

</mosaic_0001>

<bundles_post_ra>
// kernel: tpu_custom_call.1
= control target key start
LH: loop header
LB: loop body
LE: loop exit
PB: predicated region body
PF: predicated region fallthrough
CT: control target
= control target key end

     0   :  { %s4876_s15 = smov 0   ;;  %s5937_s0 = inlined_call_operand.vmem [shape: f32[1024,16], index: 0, kind: input, shape index: {}]   ;;  %s5938_s1 = inlined_call_operand.vmem [shape: f32[120,32], index: 1, kind: input, shape index: {}]   ;;  %s5939_s2 = inlined_call_operand.vmem [shape: f32[1024,8], index: 2, kind: output, shape index: {0}]   ;;  %s5940_s3 = inlined_call_operand.vmem [shape: f32[1024,32], index: 3, kind: output, shape index: {1}]   ;;  %s5941_s4 = inlined_call_operand.vmem [shape: f32[1024,32], index: 4, kind: output, shape index: {2}]  }
   0x1 LB: > { %s3529_s16 = sadd.s32 4294967295, %s4849_s15   ;;  %p3533_p0 = scmp.ge.s32.totalorder %s4849_s15, 1  ;;  %s4849_s15 = sphi %s4876_s15, %s15_s15  }
   0x2   : > { %p168_p1 = scmp.lt.s32.totalorder %s4849_s15, 3 }
   0x4   : > { %p169_p2 = pnand %p3533_p0, %p168_p1 }
   0x5   : > { %v292_v0 = vld [vmem:[%s5938_s1 + $0x8] sm:$0xff] (!%p169_p2)  ;;  %v293_v1 = vld [vmem:[%s5938_s1 + $0x10] sm:$0xff] (!%p169_p2)  ;;  %s3534_s21 = sshll.u32 (!%p169_p2), %s3529_s16, 6  ;;  %vm299_vm0 = vcmask (!%p169_p2), 130048   ;;  %v941_v3 = vld [vmem:[%s5938_s1 + $0x18] sm:$0xff] (!%p169_p2)  ;;  %vm950_vm1 = vcmask (!%p169_p2), 261120  }
   0x6   : > { %172 = sbr.rel (%p169_p2) target bundleno = 1040 (0x410), region = 28  ;;  %v4550_v2 = vpack.c.bf16 (!%p169_p2), %v293_v1, %v292_v0  ;;  %p205_p3 = scmp.lt.s32.totalorder (!%p169_p2), %s3534_s21, 127  ;;  %v942_v4 = vld [vmem:[%s5938_s1 + $0x20] sm:$0xff] (!%p169_p2)  ;;  %v943_v51 = vld [vmem:[%s5938_s1 + $0x28] sm:$0xff] (!%p169_p2)  ;;  %v944_v52 = vld [vmem:[%s5938_s1 + $0x30] sm:$0xff] (!%p169_p2)  ;;  %vm3212_vm2 = vcmask (!%p169_p2), 64512  }
   0x7   : > { %v4554_v5 = vpack.c.bf16 (!%p169_p2), %v942_v4, %v941_v3  ;;  %v4558_v53 = vpack.c.bf16 (!%p169_p2), %v944_v52, %v943_v51 }
   0x8   : > { %4551 = vmatprep.subr.bf16.mxu0 (!%p169_p2), %v4550_v2 }
   0x9   : > { %4553 = vmatpush3.bf16.msra.mxu0 (!%p169_p2), %v4550_v2  ;;  %4555 = vmatprep.subr.bf16.mxu1 (!%p169_p2), %v4554_v5 }
   0xa   : > { %4557 = vmatpush3.bf16.msra.mxu1 (!%p169_p2), %v4554_v5 }
   0xb   : > { %4559 = vmatprep.subr.bf16.mxu1 (!%p169_p2), %v4558_v53 }
   0xd   : > { %s5943_s21 = smov (!%p205_p3, %s3534_s21), 127 }
   0xe   : > { %s4890_s22 = sshll.u32 %s5943_s21, 3  ;;  %4561 = vmatpush3.bf16.msra.mxu1 %v4558_v53 }
   0xf   : > { %s4902_s29 = scalar_lea.vmem %s5937_s0, %s4890_s22  ;;  %s5054_s17 = scalar_lea.vmem %s5941_s4, %s4890_s22 }
  0x10   : > { %v228_v6 = vld [vmem:[%s4902_s29] sm:$0xff]  ;;  %v229_v7 = vld [vmem:[%s4902_s29 + $0x8] sm:$0xff]  ;;  %v230_v8 = vld [vmem:[%s4902_s29 + $0x10] sm:$0xff]  ;;  %s5472_s11 = scalar_lea.vmem %s5940_s3, %s4890_s22 }
  0x11   : > { %4142 = vmatprep.mubr.msk.f32.mxu0 %vm299_vm0, %v228_v6  ;;  %v231_v9 = vld [vmem:[%s4902_s29 + $0x18] sm:$0xff]  ;;  %v232_v10 = vld [vmem:[%s4902_s29 + $0x20] sm:$0xff]  ;;  %v233_v11 = vld [vmem:[%s4902_s29 + $0x28] sm:$0xff] }
  0x12   : > { %4143 = vmatmul.mubr.msk.f32.vlgmr.msra.gmra.mrb[0].mxu0 %vm299_vm0, %v229_v7  ;;  %v234_v12 = vld [vmem:[%s4902_s29 + $0x30] sm:$0xff]  ;;  %v235_v13 = vld [vmem:[%s4902_s29 + $0x38] sm:$0xff]  ;;  %v236_v14 = vld [vmem:[%s4902_s29 + $0x40] sm:$0xff] }
  0x13   : > { %4145 = vmatprep.mubr.msk.f32.mxu0 %vm299_vm0, %v230_v8  ;;  %v237_v15 = vld [vmem:[%s4902_s29 + $0x48] sm:$0xff]  ;;  %v238_v16 = vld [vmem:[%s4902_s29 + $0x50] sm:$0xff]  ;;  %v239_v17 = vld [vmem:[%s4902_s29 + $0x58] sm:$0xff] }
  0x14   : > { %v240_v18 = vld [vmem:[%s4902_s29 + $0x60] sm:$0xff]  ;;  %v241_v19 = vld [vmem:[%s4902_s29 + $0x68] sm:$0xff]  ;;  %v242_v20 = vld [vmem:[%s4902_s29 + $0x70] sm:$0xff] }
  0x15   : > { %v243_v21 = vld [vmem:[%s4902_s29 + $0x78] sm:$0xff]  ;;  %v244_v22 = vld [vmem:[%s4902_s29 + $0x80] sm:$0xff]  ;;  %v245_v23 = vld [vmem:[%s4902_s29 + $0x88] sm:$0xff] }
  0x16   : > { %4146 = vmatmul.mubr.msk.f32.gmra.mrb[2].mxu0 %vm299_vm0, %v231_v9  ;;  %v246_v24 = vld [vmem:[%s4902_s29 + $0x90] sm:$0xff]  ;;  %v247_v25 = vld [vmem:[%s4902_s29 + $0x98] sm:$0xff]  ;;  %v248_v26 = vld [vmem:[%s4902_s29 + $0xa0] sm:$0xff] }
  0x17   : > { %4148 = vmatprep.mubr.msk.f32.mxu0 %vm299_vm0, %v232_v10  ;;  %v249_v27 = vld [vmem:[%s4902_s29 + $0xa8] sm:$0xff]  ;;  %v250_v28 = vld [vmem:[%s4902_s29 + $0xb0] sm:$0xff]  ;;  %v251_v29 = vld [vmem:[%s4902_s29 + $0xb8] sm:$0xff] }
  0x18   : > { %v252_v30 = vld [vmem:[%s4902_s29 + $0xc0] sm:$0xff]  ;;  %v253_v31 = vld [vmem:[%s4902_s29 + $0xc8] sm:$0xff]  ;;  %v254_v32 = vld [vmem:[%s4902_s29 + $0xd0] sm:$0xff] }
  0x19   : > { %v255_v33 = vld [vmem:[%s4902_s29 + $0xd8] sm:$0xff]  ;;  %v256_v34 = vld [vmem:[%s4902_s29 + $0xe0] sm:$0xff]  ;;  %v257_v35 = vld [vmem:[%s4902_s29 + $0xe8] sm:$0xff] }
  0x1a   : > { %4149 = vmatmul.mubr.msk.f32.gmra.mrb[4].mxu0 %vm299_vm0, %v233_v11  ;;  %v258_v36 = vld [vmem:[%s4902_s29 + $0xf0] sm:$0xff]  ;;  %v259_v37 = vld [vmem:[%s4902_s29 + $0xf8] sm:$0xff]  ;;  %v260_v38 = vld [vmem:[%s4902_s29 + $0x100] sm:$0xff] }
  0x1b   : > { %4151 = vmatprep.mubr.msk.f32.mxu0 %vm299_vm0, %v234_v12  ;;  %v261_v39 = vld [vmem:[%s4902_s29 + $0x108] sm:$0xff]  ;;  %v262_v40 = vld [vmem:[%s4902_s29 + $0x110] sm:$0xff]  ;;  %v263_v41 = vld [vmem:[%s4902_s29 + $0x118] sm:$0xff] }
  0x1c   : > { %v264_v42 = vld [vmem:[%s4902_s29 + $0x120] sm:$0xff]  ;;  %v265_v43 = vld [vmem:[%s4902_s29 + $0x128] sm:$0xff]  ;;  %v266_v44 = vld [vmem:[%s4902_s29 + $0x130] sm:$0xff] }
  0x1d   : > { %v267_v45 = vld [vmem:[%s4902_s29 + $0x138] sm:$0xff]  ;;  %v268_v46 = vld [vmem:[%s4902_s29 + $0x140] sm:$0xff]  ;;  %v269_v47 = vld [vmem:[%s4902_s29 + $0x148] sm:$0xff] }
  0x1e   : > { %4152 = vmatmul.mubr.msk.f32.gmra.mrb[6].mxu0 %vm299_vm0, %v235_v13  ;;  %v270_v48 = vld [vmem:[%s4902_s29 + $0x150] sm:$0xff]  ;;  %v271_v49 = vld [vmem:[%s4902_s29 + $0x158] sm:$0xff]  ;;  %v272_v50 = vld [vmem:[%s4902_s29 + $0x160] sm:$0xff] }
  0x1f   : > { %4154 = vmatprep.mubr.msk.f32.mxu0 %vm299_vm0, %v236_v14  ;;  %v273_v54 = vld [vmem:[%s4902_s29 + $0x168] sm:$0xff]  ;;  %v274_v55 = vld [vmem:[%s4902_s29 + $0x170] sm:$0xff]  ;;  %v275_v56 = vld [vmem:[%s4902_s29 + $0x178] sm:$0xff] }
  0x20   : > { %v276_v57 = vld [vmem:[%s4902_s29 + $0x180] sm:$0xff]  ;;  %v277_v58 = vld [vmem:[%s4902_s29 + $0x188] sm:$0xff]  ;;  %v278_v59 = vld [vmem:[%s4902_s29 + $0x190] sm:$0xff] }
  0x21   : > { %v279_v60 = vld [vmem:[%s4902_s29 + $0x198] sm:$0xff]  ;;  %v280_v61 = vld [vmem:[%s4902_s29 + $0x1a0] sm:$0xff]  ;;  %v281_v62 = vld [vmem:[%s4902_s29 + $0x1a8] sm:$0xff] }
  0x22   : > { %4155 = vmatmul.mubr.msk.f32.gmra.mrb[8].mxu0 %vm299_vm0, %v237_v15  ;;  %v282_v63 = vld [vmem:[%s4902_s29 + $0x1b0] sm:$0xff]  ;;  %v283_v0 = vld [vmem:[%s4902_s29 + $0x1b8] sm:$0xff]  ;;  %v284_v1 = vld [vmem:[%s4902_s29 + $0x1c0] sm:$0xff] }
  0x23   : > { %4157 = vmatprep.mubr.msk.f32.mxu0 %vm299_vm0, %v238_v16  ;;  %v285_v2 = vld [vmem:[%s4902_s29 + $0x1c8] sm:$0xff]  ;;  %v286_v3 = vld [vmem:[%s4902_s29 + $0x1d0] sm:$0xff]  ;;  %v287_v4 = vld [vmem:[%s4902_s29 + $0x1d8] sm:$0xff] }
  0x24   : > { %v288_v5 = vld [vmem:[%s4902_s29 + $0x1e0] sm:$0xff]  ;;  %v289_v6 = vld [vmem:[%s4902_s29 + $0x1e8] sm:$0xff]  ;;  %v290_v7 = vld [vmem:[%s4902_s29 + $0x1f0] sm:$0xff] }
  0x25   : > { %v291_v8 = vld [vmem:[%s4902_s29 + $0x1f8] sm:$0xff]  ;;  %v1593_v10 = vld [vmem:[%s5938_s1 + $0x40] sm:$0xff] }
  0x26   : > { %4158 = vmatmul.mubr.msk.f32.gmra.mrb[10].mxu0 %vm299_vm0, %v239_v17  ;;  %v1592_v9 = vld [vmem:[%s5938_s1 + $0x38] sm:$0xff]  ;;  %v5047_v12 = vld [vmem:[%s5938_s1] ss:$0 sm:$0xff] }
  0x27   : > { %4160 = vmatprep.mubr.msk.f32.mxu0 %vm299_vm0, %v240_v18  ;;  %v4562_v11 = vpack.c.bf16 %v1593_v10, %v1592_v9  ;;  %v1594_v18 = vld [vmem:[%s5938_s1 + $0x48] sm:$0xff] }
  0x29   : > { %4563 = vmatprep.subr.bf16.mxu0 %v4562_v11 }
  0x2a   : > { %4161 = vmatmul.mubr.msk.f32.gmra.mrb[12].mxu0 %vm299_vm0, %v241_v19  ;;  %v1595_v19 = vld [vmem:[%s5938_s1 + $0x50] sm:$0xff] }
  0x2b   : > { %4163 = vmatprep.mubr.msk.f32.mxu0 %vm299_vm0, %v242_v20  ;;  %4565 = vmatpush3.bf16.msra.mxu0 %v4562_v11 }
  0x2e   : > { %4164 = vmatmul.mubr.msk.f32.gmra.mrb[14].mxu0 %vm299_vm0, %v243_v21 }
  0x2f   : > { %4166 = vmatprep.mubr.msk.f32.mxu0 %vm299_vm0, %v244_v22  ;;  %v4566_v22 = vpack.c.bf16 %v1595_v19, %v1594_v18 }
  0x31   : > { %4567 = vmatprep.subr.bf16.mxu0 %v4566_v22 }
  0x32   : > { %4167 = vmatmul.mubr.msk.f32.gmra.mrb[16].mxu0 %vm299_vm0, %v245_v23 }
  0x33   : > { %4169 = vmatprep.mubr.msk.f32.mxu0 %vm299_vm0, %v246_v24  ;;  %4569 = vmatpush3.bf16.msra.mxu0 %v4566_v22 }
  0x36   : > { %4170 = vmatmul.mubr.msk.f32.gmra.mrb[18].mxu0 %vm299_vm0, %v247_v25 }
  0x37   : > { %4172 = vmatprep.mubr.msk.f32.mxu0 %vm299_vm0, %v248_v26 }
  0x3a   : > { %4173 = vmatmul.mubr.msk.f32.gmra.mrb[20].mxu0 %vm299_vm0, %v249_v27 }
  0x3b   : > { %4175 = vmatprep.mubr.msk.f32.mxu0 %vm299_vm0, %v250_v28 }
  0x3e   : > { %4176 = vmatmul.mubr.msk.f32.gmra.mrb[22].mxu0 %vm299_vm0, %v251_v29 }
  0x3f   : > { %4178 = vmatprep.mubr.msk.f32.mxu0 %vm299_vm0, %v252_v30 }
  0x42   : > { %4179 = vmatmul.mubr.msk.f32.gmra.mrb[24].mxu0 %vm299_vm0, %v253_v31 }
  0x43   : > { %4181 = vmatprep.mubr.msk.f32.mxu0 %vm299_vm0, %v254_v32 }
  0x46   : > { %4182 = vmatmul.mubr.msk.f32.gmra.mrb[26].mxu0 %vm299_vm0, %v255_v33 }
  0x47   : > { %4184 = vmatprep.mubr.msk.f32.mxu0 %vm299_vm0, %v256_v34 }
  0x4a   : > { %4185 = vmatmul.mubr.msk.f32.gmra.mrb[28].mxu0 %vm299_vm0, %v257_v35 }
  0x4b   : > { %4187 = vmatprep.mubr.msk.f32.mxu0 %vm299_vm0, %v258_v36 }
  0x4e   : > { %4188 = vmatmul.mubr.msk.f32.gmra.mrb[30].mxu0 %vm299_vm0, %v259_v37 }
  0x4f   : > { %4190 = vmatprep.mubr.msk.f32.mxu0 %vm299_vm0, %v260_v38 }
  0x52   : > { %4191 = vmatmul.mubr.msk.f32.gmra.mrb[32].mxu0 %vm299_vm0, %v261_v39 }
  0x53   : > { %4193 = vmatprep.mubr.msk.f32.mxu0 %vm299_vm0, %v262_v40 }
  0x56   : > { %4194 = vmatmul.mubr.msk.f32.gmra.mrb[34].mxu0 %vm299_vm0, %v263_v41 }
  0x57   : > { %4196 = vmatprep.mubr.msk.f32.mxu0 %vm299_vm0, %v264_v42 }
  0x5a   : > { %4197 = vmatmul.mubr.msk.f32.gmra.mrb[36].mxu0 %vm299_vm0, %v265_v43 }
  0x5b   : > { %4199 = vmatprep.mubr.msk.f32.mxu0 %vm299_vm0, %v266_v44 }
  0x5e   : > { %4200 = vmatmul.mubr.msk.f32.gmra.mrb[38].mxu0 %vm299_vm0, %v267_v45 }
  0x5f   : > { %4202 = vmatprep.mubr.msk.f32.mxu0 %vm299_vm0, %v268_v46 }
  0x62   : > { %4203 = vmatmul.mubr.msk.f32.gmra.mrb[40].mxu0 %vm299_vm0, %v269_v47 }
  0x63   : > { %4205 = vmatprep.mubr.msk.f32.mxu0 %vm299_vm0, %v270_v48 }
  0x66   : > { %4206 = vmatmul.mubr.msk.f32.gmra.mrb[42].mxu0 %vm299_vm0, %v271_v49 }
  0x67   : > { %4208 = vmatprep.mubr.msk.f32.mxu0 %vm299_vm0, %v272_v50 }
  0x6a   : > { %4209 = vmatmul.mubr.msk.f32.gmra.mrb[44].mxu0 %vm299_vm0, %v273_v54 }
  0x6b   : > { %4211 = vmatprep.mubr.msk.f32.mxu0 %vm299_vm0, %v274_v55 }
  0x6e   : > { %4212 = vmatmul.mubr.msk.f32.gmra.mrb[46].mxu0 %vm299_vm0, %v275_v56 }
  0x6f   : > { %4214 = vmatprep.mubr.msk.f32.mxu0 %vm299_vm0, %v276_v57 }
  0x72   : > { %4215 = vmatmul.mubr.msk.f32.gmra.mrb[48].mxu0 %vm299_vm0, %v277_v58 }
  0x73   : > { %4217 = vmatprep.mubr.msk.f32.mxu0 %vm299_vm0, %v278_v59 }
  0x76   : > { %4218 = vmatmul.mubr.msk.f32.gmra.mrb[50].mxu0 %vm299_vm0, %v279_v60 }
  0x77   : > { %4220 = vmatprep.mubr.msk.f32.mxu0 %vm299_vm0, %v280_v61 }
  0x7a   : > { %4221 = vmatmul.mubr.msk.f32.gmra.mrb[52].mxu0 %vm299_vm0, %v281_v62 }
  0x7b   : > { %4223 = vmatprep.mubr.msk.f32.mxu0 %vm299_vm0, %v282_v63 }
  0x7e   : > { %4224 = vmatmul.mubr.msk.f32.gmra.mrb[54].mxu0 %vm299_vm0, %v283_v0 }
  0x7f   : > { %4226 = vmatprep.mubr.msk.f32.mxu0 %vm299_vm0, %v284_v1 }
  0x82   : > { %4227 = vmatmul.mubr.msk.f32.gmra.mrb[56].mxu0 %vm299_vm0, %v285_v2 }
  0x83   : > { %4229 = vmatprep.mubr.msk.f32.mxu0 %vm299_vm0, %v286_v3 }
  0x86   : > { %4230 = vmatmul.mubr.msk.f32.gmra.mrb[58].mxu0 %vm299_vm0, %v287_v4 }
  0x87   : > { %4232 = vmatprep.mubr.msk.f32.mxu0 %vm299_vm0, %v288_v5 }
  0x8a   : > { %4233 = vmatmul.mubr.msk.f32.gmra.mrb[60].mxu0 %vm299_vm0, %v289_v6 }
  0x8b   : > { %4235 = vmatprep.mubr.msk.f32.mxu0 %vm299_vm0, %v290_v7 }
  0x8e   : > { %4236 = vmatmul.mubr.msk.f32.gmra.mrb[62].mxu0 %vm299_vm0, %v291_v8 }
  0xe5   : > { %v4144_v13 = vpop.f32.mrb[0].mxu0 }
  0xe6   : > { %v564_v14 = vadd.f32 %v4144_v13, %v5047_v12  ;;  %v558_v15 = vpop.f32.mrb[1].mxu0 }
  0xe7   : > { %v559_v16 = vadd.f32 %v5047_v12, %v558_v15 }
  0xe8   : > { %v878_v17 = vmax.f32 %v564_v14, 0.0 }
  0xe9   : > { %v877_v20 = vmax.f32 %v559_v16, 0.0  ;;  %v4147_v21 = vpop.f32.mrb[2].mxu0 }
  0xea   : > { %3342 = vst.msk [vmem:[%s5054_s17 + $0x8] sm:$0xff] %vm950_vm1, %v878_v17  ;;  %v574_v23 = vadd.f32 %v4147_v21, %v5047_v12  ;;  %v568_v24 = vpop.f32.mrb[3].mxu0 }
  0xeb   : > { %3341 = vst.msk [vmem:[%s5054_s17] sm:$0xff] %vm950_vm1, %v877_v20  ;;  %v569_v25 = vadd.f32 %v5047_v12, %v568_v24  ;;  %4246 = vmatprep.mubr.msk.f32.mxu1 %vm950_vm1, %v877_v20 }
  0xec   : > { %v880_v26 = vmax.f32 %v574_v23, 0.0  ;;  %4247 = vmatmul.mubr.msk.f32.vlgmr.msra.gmra.mrb[0].mxu1 %vm950_vm1, %v878_v17 }
  0xed   : > { %v879_v27 = vmax.f32 %v569_v25, 0.0  ;;  %v4150_v28 = vpop.f32.mrb[4].mxu0 }
  0xee   : > { %3344 = vst.msk [vmem:[%s5054_s17 + $0x18] sm:$0xff] %vm950_vm1, %v880_v26  ;;  %v584_v29 = vadd.f32 %v4150_v28, %v5047_v12  ;;  %v578_v30 = vpop.f32.mrb[5].mxu0 }
  0xef   : > { %3343 = vst.msk [vmem:[%s5054_s17 + $0x10] sm:$0xff] %vm950_vm1, %v879_v27  ;;  %v579_v31 = vadd.f32 %v5047_v12, %v578_v30  ;;  %4249 = vmatprep.mubr.msk.f32.mxu1 %vm950_vm1, %v879_v27 }
  0xf0   : > { %v882_v32 = vmax.f32 %v584_v29, 0.0  ;;  %4250 = vmatmul.mubr.msk.f32.gmra.mrb[2].mxu1 %vm950_vm1, %v880_v26 }
  0xf1   : > { %v881_v33 = vmax.f32 %v579_v31, 0.0  ;;  %v4153_v34 = vpop.f32.mrb[6].mxu0 }
  0xf2   : > { %3346 = vst.msk [vmem:[%s5054_s17 + $0x28] sm:$0xff] %vm950_vm1, %v882_v32  ;;  %v594_v35 = vadd.f32 %v4153_v34, %v5047_v12  ;;  %v588_v36 = vpop.f32.mrb[7].mxu0 }
  0xf3   : > { %3345 = vst.msk [vmem:[%s5054_s17 + $0x20] sm:$0xff] %vm950_vm1, %v881_v33  ;;  %v589_v37 = vadd.f32 %v5047_v12, %v588_v36  ;;  %4252 = vmatprep.mubr.msk.f32.mxu1 %vm950_vm1, %v881_v33 }
  0xf4   : > { %v884_v38 = vmax.f32 %v594_v35, 0.0  ;;  %4253 = vmatmul.mubr.msk.f32.gmra.mrb[4].mxu1 %vm950_vm1, %v882_v32 }
  0xf5   : > { %v883_v39 = vmax.f32 %v589_v37, 0.0  ;;  %v4156_v40 = vpop.f32.mrb[8].mxu0 }
  0xf6   : > { %3348 = vst.msk [vmem:[%s5054_s17 + $0x38] sm:$0xff] %vm950_vm1, %v884_v38  ;;  %v604_v41 = vadd.f32 %v4156_v40, %v5047_v12  ;;  %v598_v42 = vpop.f32.mrb[9].mxu0 }
  0xf7   : > { %3347 = vst.msk [vmem:[%s5054_s17 + $0x30] sm:$0xff] %vm950_vm1, %v883_v39  ;;  %v599_v43 = vadd.f32 %v5047_v12, %v598_v42  ;;  %4255 = vmatprep.mubr.msk.f32.mxu1 %vm950_vm1, %v883_v39 }
  0xf8   : > { %v886_v44 = vmax.f32 %v604_v41, 0.0  ;;  %4256 = vmatmul.mubr.msk.f32.gmra.mrb[6].mxu1 %vm950_vm1, %v884_v38 }
  0xf9   : > { %v885_v45 = vmax.f32 %v599_v43, 0.0  ;;  %v4159_v46 = vpop.f32.mrb[10].mxu0 }
  0xfa   : > { %3350 = vst.msk [vmem:[%s5054_s17 + $0x48] sm:$0xff] %vm950_vm1, %v886_v44  ;;  %v614_v47 = vadd.f32 %v4159_v46, %v5047_v12  ;;  %v608_v48 = vpop.f32.mrb[11].mxu0 }
  0xfb   : > { %3349 = vst.msk [vmem:[%s5054_s17 + $0x40] sm:$0xff] %vm950_vm1, %v885_v45  ;;  %v609_v49 = vadd.f32 %v5047_v12, %v608_v48  ;;  %4258 = vmatprep.mubr.msk.f32.mxu1 %vm950_vm1, %v885_v45 }
  0xfc   : > { %v888_v50 = vmax.f32 %v614_v47, 0.0  ;;  %4259 = vmatmul.mubr.msk.f32.gmra.mrb[8].mxu1 %vm950_vm1, %v886_v44 }
  0xfd   : > { %v887_v51 = vmax.f32 %v609_v49, 0.0  ;;  %v4162_v52 = vpop.f32.mrb[12].mxu0 }
  0xfe   : > { %3352 = vst.msk [vmem:[%s5054_s17 + $0x58] sm:$0xff] %vm950_vm1, %v888_v50  ;;  %v624_v53 = vadd.f32 %v4162_v52, %v5047_v12  ;;  %v618_v54 = vpop.f32.mrb[13].mxu0 }
  0xff   : > { %3351 = vst.msk [vmem:[%s5054_s17 + $0x50] sm:$0xff] %vm950_vm1, %v887_v51  ;;  %v619_v55 = vadd.f32 %v5047_v12, %v618_v54  ;;  %4261 = vmatprep.mubr.msk.f32.mxu1 %vm950_vm1, %v887_v51 }
 0x100   : > { %v890_v56 = vmax.f32 %v624_v53, 0.0  ;;  %4262 = vmatmul.mubr.msk.f32.gmra.mrb[10].mxu1 %vm950_vm1, %v888_v50 }
 0x101   : > { %v889_v57 = vmax.f32 %v619_v55, 0.0  ;;  %v4165_v58 = vpop.f32.mrb[14].mxu0 }
 0x102   : > { %3354 = vst.msk [vmem:[%s5054_s17 + $0x68] sm:$0xff] %vm950_vm1, %v890_v56  ;;  %v634_v59 = vadd.f32 %v4165_v58, %v5047_v12  ;;  %v628_v60 = vpop.f32.mrb[15].mxu0 }
 0x103   : > { %3353 = vst.msk [vmem:[%s5054_s17 + $0x60] sm:$0xff] %vm950_vm1, %v889_v57  ;;  %v629_v61 = vadd.f32 %v5047_v12, %v628_v60  ;;  %4264 = vmatprep.mubr.msk.f32.mxu1 %vm950_vm1, %v889_v57 }
 0x104   : > { %v892_v62 = vmax.f32 %v634_v59, 0.0  ;;  %4265 = vmatmul.mubr.msk.f32.gmra.mrb[12].mxu1 %vm950_vm1, %v890_v56 }
 0x105   : > { %v891_v63 = vmax.f32 %v629_v61, 0.0  ;;  %v4168_v0 = vpop.f32.mrb[16].mxu0 }
 0x106   : > { %3356 = vst.msk [vmem:[%s5054_s17 + $0x78] sm:$0xff] %vm950_vm1, %v892_v62  ;;  %v644_v1 = vadd.f32 %v4168_v0, %v5047_v12  ;;  %v638_v2 = vpop.f32.mrb[17].mxu0 }
 0x107   : > { %3355 = vst.msk [vmem:[%s5054_s17 + $0x70] sm:$0xff] %vm950_vm1, %v891_v63  ;;  %v639_v3 = vadd.f32 %v5047_v12, %v638_v2  ;;  %4267 = vmatprep.mubr.msk.f32.mxu1 %vm950_vm1, %v891_v63 }
 0x108   : > { %v894_v4 = vmax.f32 %v644_v1, 0.0  ;;  %4268 = vmatmul.mubr.msk.f32.gmra.mrb[14].mxu1 %vm950_vm1, %v892_v62 }
 0x109   : > { %v893_v5 = vmax.f32 %v639_v3, 0.0  ;;  %v4171_v6 = vpop.f32.mrb[18].mxu0 }
 0x10a   : > { %3358 = vst.msk [vmem:[%s5054_s17 + $0x88] sm:$0xff] %vm950_vm1, %v894_v4  ;;  %v654_v7 = vadd.f32 %v4171_v6, %v5047_v12  ;;  %v648_v8 = vpop.f32.mrb[19].mxu0 }
 0x10b   : > { %3357 = vst.msk [vmem:[%s5054_s17 + $0x80] sm:$0xff] %vm950_vm1, %v893_v5  ;;  %v649_v9 = vadd.f32 %v5047_v12, %v648_v8  ;;  %4270 = vmatprep.mubr.msk.f32.mxu1 %vm950_vm1, %v893_v5 }
 0x10c   : > { %v896_v10 = vmax.f32 %v654_v7, 0.0  ;;  %4271 = vmatmul.mubr.msk.f32.gmra.mrb[16].mxu1 %vm950_vm1, %v894_v4 }
 0x10d   : > { %v895_v11 = vmax.f32 %v649_v9, 0.0  ;;  %v4174_v13 = vpop.f32.mrb[20].mxu0 }
 0x10e   : > { %3360 = vst.msk [vmem:[%s5054_s17 + $0x98] sm:$0xff] %vm950_vm1, %v896_v10  ;;  %v664_v14 = vadd.f32 %v4174_v13, %v5047_v12  ;;  %v658_v15 = vpop.f32.mrb[21].mxu0 }
 0x10f   : > { %3359 = vst.msk [vmem:[%s5054_s17 + $0x90] sm:$0xff] %vm950_vm1, %v895_v11  ;;  %v659_v16 = vadd.f32 %v5047_v12, %v658_v15  ;;  %4273 = vmatprep.mubr.msk.f32.mxu1 %vm950_vm1, %v895_v11 }
 0x110   : > { %v898_v17 = vmax.f32 %v664_v14, 0.0  ;;  %4274 = vmatmul.mubr.msk.f32.gmra.mrb[18].mxu1 %vm950_vm1, %v896_v10 }
 0x111   : > { %v897_v18 = vmax.f32 %v659_v16, 0.0  ;;  %v4177_v19 = vpop.f32.mrb[22].mxu0 }
 0x112   : > { %3362 = vst.msk [vmem:[%s5054_s17 + $0xa8] sm:$0xff] %vm950_vm1, %v898_v17  ;;  %v674_v20 = vadd.f32 %v4177_v19, %v5047_v12  ;;  %v668_v21 = vpop.f32.mrb[23].mxu0 }
 0x113   : > { %3361 = vst.msk [vmem:[%s5054_s17 + $0xa0] sm:$0xff] %vm950_vm1, %v897_v18  ;;  %v669_v22 = vadd.f32 %v5047_v12, %v668_v21  ;;  %4276 = vmatprep.mubr.msk.f32.mxu1 %vm950_vm1, %v897_v18 }
 0x114   : > { %v900_v23 = vmax.f32 %v674_v20, 0.0  ;;  %4277 = vmatmul.mubr.msk.f32.gmra.mrb[20].mxu1 %vm950_vm1, %v898_v17 }
 0x115   : > { %v899_v24 = vmax.f32 %v669_v22, 0.0  ;;  %v4180_v25 = vpop.f32.mrb[24].mxu0 }
 0x116   : > { %3364 = vst.msk [vmem:[%s5054_s17 + $0xb8] sm:$0xff] %vm950_vm1, %v900_v23  ;;  %v684_v26 = vadd.f32 %v4180_v25, %v5047_v12  ;;  %v678_v27 = vpop.f32.mrb[25].mxu0 }
 0x117   : > { %3363 = vst.msk [vmem:[%s5054_s17 + $0xb0] sm:$0xff] %vm950_vm1, %v899_v24  ;;  %v679_v28 = vadd.f32 %v5047_v12, %v678_v27  ;;  %4279 = vmatprep.mubr.msk.f32.mxu1 %vm950_vm1, %v899_v24 }
 0x118   : > { %v902_v29 = vmax.f32 %v684_v26, 0.0  ;;  %4280 = vmatmul.mubr.msk.f32.gmra.mrb[22].mxu1 %vm950_vm1, %v900_v23 }
 0x119   : > { %v901_v30 = vmax.f32 %v679_v28, 0.0  ;;  %v4183_v31 = vpop.f32.mrb[26].mxu0 }
 0x11a   : > { %3366 = vst.msk [vmem:[%s5054_s17 + $0xc8] sm:$0xff] %vm950_vm1, %v902_v29  ;;  %v694_v32 = vadd.f32 %v4183_v31, %v5047_v12  ;;  %v688_v33 = vpop.f32.mrb[27].mxu0 }
 0x11b   : > { %3365 = vst.msk [vmem:[%s5054_s17 + $0xc0] sm:$0xff] %vm950_vm1, %v901_v30  ;;  %v689_v34 = vadd.f32 %v5047_v12, %v688_v33  ;;  %4282 = vmatprep.mubr.msk.f32.mxu1 %vm950_vm1, %v901_v30 }
 0x11c   : > { %v904_v35 = vmax.f32 %v694_v32, 0.0  ;;  %4283 = vmatmul.mubr.msk.f32.gmra.mrb[24].mxu1 %vm950_vm1, %v902_v29 }
 0x11d   : > { %v903_v36 = vmax.f32 %v689_v34, 0.0  ;;  %v4186_v37 = vpop.f32.mrb[28].mxu0 }
 0x11e   : > { %3368 = vst.msk [vmem:[%s5054_s17 + $0xd8] sm:$0xff] %vm950_vm1, %v904_v35  ;;  %v704_v38 = vadd.f32 %v4186_v37, %v5047_v12  ;;  %v698_v39 = vpop.f32.mrb[29].mxu0 }
 0x11f   : > { %3367 = vst.msk [vmem:[%s5054_s17 + $0xd0] sm:$0xff] %vm950_vm1, %v903_v36  ;;  %v699_v40 = vadd.f32 %v5047_v12, %v698_v39  ;;  %4285 = vmatprep.mubr.msk.f32.mxu1 %vm950_vm1, %v903_v36 }
 0x120   : > { %v906_v41 = vmax.f32 %v704_v38, 0.0  ;;  %4286 = vmatmul.mubr.msk.f32.gmra.mrb[26].mxu1 %vm950_vm1, %v904_v35 }
 0x121   : > { %v905_v42 = vmax.f32 %v699_v40, 0.0  ;;  %v4189_v43 = vpop.f32.mrb[30].mxu0 }
 0x122   : > { %3370 = vst.msk [vmem:[%s5054_s17 + $0xe8] sm:$0xff] %vm950_vm1, %v906_v41  ;;  %v714_v44 = vadd.f32 %v4189_v43, %v5047_v12  ;;  %v708_v45 = vpop.f32.mrb[31].mxu0 }
 0x123   : > { %3369 = vst.msk [vmem:[%s5054_s17 + $0xe0] sm:$0xff] %vm950_vm1, %v905_v42  ;;  %v709_v46 = vadd.f32 %v5047_v12, %v708_v45  ;;  %4288 = vmatprep.mubr.msk.f32.mxu1 %vm950_vm1, %v905_v42 }
 0x124   : > { %v908_v47 = vmax.f32 %v714_v44, 0.0  ;;  %4289 = vmatmul.mubr.msk.f32.gmra.mrb[28].mxu1 %vm950_vm1, %v906_v41 }
 0x125   : > { %v907_v48 = vmax.f32 %v709_v46, 0.0  ;;  %v4192_v49 = vpop.f32.mrb[32].mxu0 }
 0x126   : > { %3372 = vst.msk [vmem:[%s5054_s17 + $0xf8] sm:$0xff] %vm950_vm1, %v908_v47  ;;  %v724_v50 = vadd.f32 %v4192_v49, %v5047_v12  ;;  %v718_v51 = vpop.f32.mrb[33].mxu0 }
 0x127   : > { %3371 = vst.msk [vmem:[%s5054_s17 + $0xf0] sm:$0xff] %vm950_vm1, %v907_v48  ;;  %v719_v52 = vadd.f32 %v5047_v12, %v718_v51  ;;  %4291 = vmatprep.mubr.msk.f32.mxu1 %vm950_vm1, %v907_v48 }
 0x128   : > { %v910_v53 = vmax.f32 %v724_v50, 0.0  ;;  %4292 = vmatmul.mubr.msk.f32.gmra.mrb[30].mxu1 %vm950_vm1, %v908_v47 }
 0x129   : > { %v909_v54 = vmax.f32 %v719_v52, 0.0  ;;  %v4195_v55 = vpop.f32.mrb[34].mxu0 }
 0x12a   : > { %3374 = vst.msk [vmem:[%s5054_s17 + $0x108] sm:$0xff] %vm950_vm1, %v910_v53  ;;  %v734_v56 = vadd.f32 %v4195_v55, %v5047_v12  ;;  %v728_v57 = vpop.f32.mrb[35].mxu0 }
 0x12b   : > { %3373 = vst.msk [vmem:[%s5054_s17 + $0x100] sm:$0xff] %vm950_vm1, %v909_v54  ;;  %v729_v58 = vadd.f32 %v5047_v12, %v728_v57  ;;  %4294 = vmatprep.mubr.msk.f32.mxu1 %vm950_vm1, %v909_v54 }
 0x12c   : > { %v912_v59 = vmax.f32 %v734_v56, 0.0  ;;  %4295 = vmatmul.mubr.msk.f32.gmra.mrb[32].mxu1 %vm950_vm1, %v910_v53 }
 0x12d   : > { %v911_v60 = vmax.f32 %v729_v58, 0.0  ;;  %v4198_v61 = vpop.f32.mrb[36].mxu0 }
 0x12e   : > { %3376 = vst.msk [vmem:[%s5054_s17 + $0x118] sm:$0xff] %vm950_vm1, %v912_v59  ;;  %v744_v62 = vadd.f32 %v4198_v61, %v5047_v12  ;;  %v738_v63 = vpop.f32.mrb[37].mxu0 }
 0x12f   : > { %3375 = vst.msk [vmem:[%s5054_s17 + $0x110] sm:$0xff] %vm950_vm1, %v911_v60  ;;  %v739_v0 = vadd.f32 %v5047_v12, %v738_v63  ;;  %4297 = vmatprep.mubr.msk.f32.mxu1 %vm950_vm1, %v911_v60 }
 0x130   : > { %v914_v1 = vmax.f32 %v744_v62, 0.0  ;;  %4298 = vmatmul.mubr.msk.f32.gmra.mrb[34].mxu1 %vm950_vm1, %v912_v59 }
 0x131   : > { %v913_v2 = vmax.f32 %v739_v0, 0.0  ;;  %v4201_v3 = vpop.f32.mrb[38].mxu0 }
 0x132   : > { %3378 = vst.msk [vmem:[%s5054_s17 + $0x128] sm:$0xff] %vm950_vm1, %v914_v1  ;;  %v754_v4 = vadd.f32 %v4201_v3, %v5047_v12  ;;  %v748_v5 = vpop.f32.mrb[39].mxu0 }
 0x133   : > { %3377 = vst.msk [vmem:[%s5054_s17 + $0x120] sm:$0xff] %vm950_vm1, %v913_v2  ;;  %v749_v6 = vadd.f32 %v5047_v12, %v748_v5  ;;  %4300 = vmatprep.mubr.msk.f32.mxu1 %vm950_vm1, %v913_v2 }
 0x134   : > { %v916_v7 = vmax.f32 %v754_v4, 0.0  ;;  %4301 = vmatmul.mubr.msk.f32.gmra.mrb[36].mxu1 %vm950_vm1, %v914_v1 }
 0x135   : > { %v915_v8 = vmax.f32 %v749_v6, 0.0  ;;  %v4204_v9 = vpop.f32.mrb[40].mxu0 }
 0x136   : > { %3380 = vst.msk [vmem:[%s5054_s17 + $0x138] sm:$0xff] %vm950_vm1, %v916_v7  ;;  %v764_v10 = vadd.f32 %v4204_v9, %v5047_v12  ;;  %v758_v11 = vpop.f32.mrb[41].mxu0 }
 0x137   : > { %3379 = vst.msk [vmem:[%s5054_s17 + $0x130] sm:$0xff] %vm950_vm1, %v915_v8  ;;  %v759_v13 = vadd.f32 %v5047_v12, %v758_v11  ;;  %4303 = vmatprep.mubr.msk.f32.mxu1 %vm950_vm1, %v915_v8 }
 0x138   : > { %v918_v14 = vmax.f32 %v764_v10, 0.0  ;;  %4304 = vmatmul.mubr.msk.f32.gmra.mrb[38].mxu1 %vm950_vm1, %v916_v7 }
 0x139   : > { %v917_v15 = vmax.f32 %v759_v13, 0.0  ;;  %v4207_v16 = vpop.f32.mrb[42].mxu0 }
 0x13a   : > { %3382 = vst.msk [vmem:[%s5054_s17 + $0x148] sm:$0xff] %vm950_vm1, %v918_v14  ;;  %v774_v17 = vadd.f32 %v4207_v16, %v5047_v12  ;;  %v768_v18 = vpop.f32.mrb[43].mxu0 }
 0x13b   : > { %3381 = vst.msk [vmem:[%s5054_s17 + $0x140] sm:$0xff] %vm950_vm1, %v917_v15  ;;  %v769_v19 = vadd.f32 %v5047_v12, %v768_v18  ;;  %4306 = vmatprep.mubr.msk.f32.mxu1 %vm950_vm1, %v917_v15 }
 0x13c   : > { %v920_v20 = vmax.f32 %v774_v17, 0.0  ;;  %4307 = vmatmul.mubr.msk.f32.gmra.mrb[40].mxu1 %vm950_vm1, %v918_v14 }
 0x13d   : > { %v919_v21 = vmax.f32 %v769_v19, 0.0  ;;  %v4210_v22 = vpop.f32.mrb[44].mxu0  ;;  %v2242_v19 = vld [vmem:[%s5938_s1 + $0x58] sm:$0xff] }
 0x13e   : > { %3384 = vst.msk [vmem:[%s5054_s17 + $0x158] sm:$0xff] %vm950_vm1, %v920_v20  ;;  %v784_v23 = vadd.f32 %v4210_v22, %v5047_v12  ;;  %v778_v24 = vpop.f32.mrb[45].mxu0 }
 0x13f   : > { %3383 = vst.msk [vmem:[%s5054_s17 + $0x150] sm:$0xff] %vm950_vm1, %v919_v21  ;;  %v779_v25 = vadd.f32 %v5047_v12, %v778_v24  ;;  %4309 = vmatprep.mubr.msk.f32.mxu1 %vm950_vm1, %v919_v21  ;;  %v5326_v21 = vld [vmem:[%s5938_s1 + $0x1] ss:$0 sm:$0xff] }
 0x140   : > { %v922_v26 = vmax.f32 %v784_v23, 0.0  ;;  %4310 = vmatmul.mubr.msk.f32.gmra.mrb[42].mxu1 %vm950_vm1, %v920_v20 }
 0x141   : > { %v921_v27 = vmax.f32 %v779_v25, 0.0  ;;  %v4213_v28 = vpop.f32.mrb[46].mxu0 }
 0x142   : > { %3386 = vst.msk [vmem:[%s5054_s17 + $0x168] sm:$0xff] %vm950_vm1, %v922_v26  ;;  %v794_v29 = vadd.f32 %v4213_v28, %v5047_v12  ;;  %v788_v30 = vpop.f32.mrb[47].mxu0 }
 0x143   : > { %3385 = vst.msk [vmem:[%s5054_s17 + $0x160] sm:$0xff] %vm950_vm1, %v921_v27  ;;  %v789_v31 = vadd.f32 %v5047_v12, %v788_v30  ;;  %4312 = vmatprep.mubr.msk.f32.mxu1 %vm950_vm1, %v921_v27  ;;  %v2245_v27 = vld [vmem:[%s5938_s1 + $0x70] sm:$0xff] }
 0x144   : > { %v924_v32 = vmax.f32 %v794_v29, 0.0  ;;  %4313 = vmatmul.mubr.msk.f32.gmra.mrb[44].mxu1 %vm950_vm1, %v922_v26  ;;  %v2244_v26 = vld [vmem:[%s5938_s1 + $0x68] sm:$0xff] }
 0x145   : > { %v923_v33 = vmax.f32 %v789_v31, 0.0  ;;  %v4216_v34 = vpop.f32.mrb[48].mxu0  ;;  %v4574_v30 = vpack.c.bf16 %v2245_v27, %v2244_v26 }
 0x146   : > { %3388 = vst.msk [vmem:[%s5054_s17 + $0x178] sm:$0xff] %vm950_vm1, %v924_v32  ;;  %v804_v35 = vadd.f32 %v4216_v34, %v5047_v12  ;;  %v798_v36 = vpop.f32.mrb[49].mxu0 }
 0x147   : > { %3387 = vst.msk [vmem:[%s5054_s17 + $0x170] sm:$0xff] %vm950_vm1, %v923_v33  ;;  %v799_v37 = vadd.f32 %v5047_v12, %v798_v36  ;;  %4315 = vmatprep.mubr.msk.f32.mxu1 %vm950_vm1, %v923_v33 }
 0x148   : > { %v926_v38 = vmax.f32 %v804_v35, 0.0  ;;  %4316 = vmatmul.mubr.msk.f32.gmra.mrb[46].mxu1 %vm950_vm1, %v924_v32 }
 0x149   : > { %v925_v39 = vmax.f32 %v799_v37, 0.0  ;;  %v4219_v40 = vpop.f32.mrb[50].mxu0 }
 0x14a   : > { %3390 = vst.msk [vmem:[%s5054_s17 + $0x188] sm:$0xff] %vm950_vm1, %v926_v38  ;;  %v814_v41 = vadd.f32 %v4219_v40, %v5047_v12  ;;  %v808_v42 = vpop.f32.mrb[51].mxu0 }
 0x14b   : > { %3389 = vst.msk [vmem:[%s5054_s17 + $0x180] sm:$0xff] %vm950_vm1, %v925_v39  ;;  %v809_v43 = vadd.f32 %v5047_v12, %v808_v42  ;;  %4318 = vmatprep.mubr.msk.f32.mxu1 %vm950_vm1, %v925_v39 }
 0x14c   : > { %v928_v44 = vmax.f32 %v814_v41, 0.0  ;;  %4319 = vmatmul.mubr.msk.f32.gmra.mrb[48].mxu1 %vm950_vm1, %v926_v38 }
 0x14d   : > { %v927_v45 = vmax.f32 %v809_v43, 0.0  ;;  %v4222_v46 = vpop.f32.mrb[52].mxu0 }
 0x14e   : > { %3392 = vst.msk [vmem:[%s5054_s17 + $0x198] sm:$0xff] %vm950_vm1, %v928_v44  ;;  %v824_v47 = vadd.f32 %v4222_v46, %v5047_v12  ;;  %v818_v48 = vpop.f32.mrb[53].mxu0 }
 0x14f   : > { %3391 = vst.msk [vmem:[%s5054_s17 + $0x190] sm:$0xff] %vm950_vm1, %v927_v45  ;;  %v819_v49 = vadd.f32 %v5047_v12, %v818_v48  ;;  %4321 = vmatprep.mubr.msk.f32.mxu1 %vm950_vm1, %v927_v45 }
 0x150   : > { %v930_v50 = vmax.f32 %v824_v47, 0.0  ;;  %4322 = vmatmul.mubr.msk.f32.gmra.mrb[50].mxu1 %vm950_vm1, %v928_v44 }
 0x151   : > { %v929_v51 = vmax.f32 %v819_v49, 0.0  ;;  %v4225_v52 = vpop.f32.mrb[54].mxu0 }
 0x152   : > { %3394 = vst.msk [vmem:[%s5054_s17 + $0x1a8] sm:$0xff] %vm950_vm1, %v930_v50  ;;  %v834_v53 = vadd.f32 %v4225_v52, %v5047_v12  ;;  %v828_v54 = vpop.f32.mrb[55].mxu0 }
 0x153   : > { %3393 = vst.msk [vmem:[%s5054_s17 + $0x1a0] sm:$0xff] %vm950_vm1, %v929_v51  ;;  %v829_v55 = vadd.f32 %v5047_v12, %v828_v54  ;;  %4324 = vmatprep.mubr.msk.f32.mxu1 %vm950_vm1, %v929_v51 }
 0x154   : > { %v932_v56 = vmax.f32 %v834_v53, 0.0  ;;  %4325 = vmatmul.mubr.msk.f32.gmra.mrb[52].mxu1 %vm950_vm1, %v930_v50 }
 0x155   : > { %v931_v57 = vmax.f32 %v829_v55, 0.0  ;;  %v4228_v58 = vpop.f32.mrb[56].mxu0 }
 0x156   : > { %3396 = vst.msk [vmem:[%s5054_s17 + $0x1b8] sm:$0xff] %vm950_vm1, %v932_v56  ;;  %v844_v59 = vadd.f32 %v4228_v58, %v5047_v12  ;;  %v838_v60 = vpop.f32.mrb[57].mxu0 }
 0x157   : > { %3395 = vst.msk [vmem:[%s5054_s17 + $0x1b0] sm:$0xff] %vm950_vm1, %v931_v57  ;;  %v839_v61 = vadd.f32 %v5047_v12, %v838_v60  ;;  %4327 = vmatprep.mubr.msk.f32.mxu1 %vm950_vm1, %v931_v57 }
 0x158   : > { %v934_v62 = vmax.f32 %v844_v59, 0.0  ;;  %4328 = vmatmul.mubr.msk.f32.gmra.mrb[54].mxu1 %vm950_vm1, %v932_v56 }
 0x159   : > { %v933_v63 = vmax.f32 %v839_v61, 0.0  ;;  %v4231_v0 = vpop.f32.mrb[58].mxu0 }
 0x15a   : > { %3398 = vst.msk [vmem:[%s5054_s17 + $0x1c8] sm:$0xff] %vm950_vm1, %v934_v62  ;;  %v854_v1 = vadd.f32 %v4231_v0, %v5047_v12  ;;  %v848_v2 = vpop.f32.mrb[59].mxu0 }
 0x15b   : > { %3397 = vst.msk [vmem:[%s5054_s17 + $0x1c0] sm:$0xff] %vm950_vm1, %v933_v63  ;;  %v849_v3 = vadd.f32 %v5047_v12, %v848_v2  ;;  %4330 = vmatprep.mubr.msk.f32.mxu1 %vm950_vm1, %v933_v63 }
 0x15c   : > { %v936_v4 = vmax.f32 %v854_v1, 0.0  ;;  %4331 = vmatmul.mubr.msk.f32.gmra.mrb[56].mxu1 %vm950_vm1, %v934_v62 }
 0x15d   : > { %v935_v5 = vmax.f32 %v849_v3, 0.0  ;;  %v4234_v6 = vpop.f32.mrb[60].mxu0 }
 0x15e   : > { %3400 = vst.msk [vmem:[%s5054_s17 + $0x1d8] sm:$0xff] %vm950_vm1, %v936_v4  ;;  %v864_v7 = vadd.f32 %v4234_v6, %v5047_v12  ;;  %v858_v8 = vpop.f32.mrb[61].mxu0 }
 0x15f   : > { %3399 = vst.msk [vmem:[%s5054_s17 + $0x1d0] sm:$0xff] %vm950_vm1, %v935_v5  ;;  %v859_v9 = vadd.f32 %v5047_v12, %v858_v8  ;;  %4333 = vmatprep.mubr.msk.f32.mxu1 %vm950_vm1, %v935_v5 }
 0x160   : > { %v938_v10 = vmax.f32 %v864_v7, 0.0  ;;  %4334 = vmatmul.mubr.msk.f32.gmra.mrb[58].mxu1 %vm950_vm1, %v936_v4 }
 0x161   : > { %v937_v11 = vmax.f32 %v859_v9, 0.0  ;;  %v4237_v13 = vpop.f32.mrb[62].mxu0 }
 0x162   : > { %3402 = vst.msk [vmem:[%s5054_s17 + $0x1e8] sm:$0xff] %vm950_vm1, %v938_v10  ;;  %v874_v14 = vadd.f32 %v4237_v13, %v5047_v12  ;;  %v868_v15 = vpop.f32.mrb[63].mxu0 }
 0x163   : > { %3401 = vst.msk [vmem:[%s5054_s17 + $0x1e0] sm:$0xff] %vm950_vm1, %v937_v11  ;;  %v869_v16 = vadd.f32 %v5047_v12, %v868_v15  ;;  %4336 = vmatprep.mubr.msk.f32.mxu1 %vm950_vm1, %v937_v11  ;;  %v2243_v12 = vld [vmem:[%s5938_s1 + $0x60] sm:$0xff] }
 0x164   : > { %v940_v17 = vmax.f32 %v874_v14, 0.0  ;;  %4337 = vmatmul.mubr.msk.f32.gmra.mrb[60].mxu1 %vm950_vm1, %v938_v10  ;;  %v4570_v20 = vpack.c.bf16 %v2243_v12, %v2242_v19 }
 0x165   : > { %v939_v18 = vmax.f32 %v869_v16, 0.0 }
 0x166   : > { %3404 = vst.msk [vmem:[%s5054_s17 + $0x1f8] sm:$0xff] %vm950_vm1, %v940_v17  ;;  %4571 = vmatprep.subr.bf16.mxu1 %v4570_v20 }
 0x167   : > { %3403 = vst.msk [vmem:[%s5054_s17 + $0x1f0] sm:$0xff] %vm950_vm1, %v939_v18  ;;  %4339 = vmatprep.mubr.msk.f32.mxu1 %vm950_vm1, %v939_v18  ;;  %4573 = vmatpush3.bf16.msra.mxu1 %v4570_v20  ;;  %s5751_s17 = scalar_lea.vmem %s5939_s2, %s4890_s22 }
 0x168   : > { %4340 = vmatmul.mubr.msk.f32.gmra.mrb[62].mxu1 %vm950_vm1, %v940_v17  ;;  %4575 = vmatprep.subr.bf16.mxu1 %v4574_v30 }
 0x16b   : > { %4577 = vmatpush3.bf16.msra.mxu1 %v4574_v30 }
 0x1bf   : > { %v4248_v22 = vpop.f32.mrb[0].mxu1 }
 0x1c0   : > { %v1215_v23 = vadd.f32 %v4248_v22, %v5326_v21  ;;  %v1209_v24 = vpop.f32.mrb[1].mxu1 }
 0x1c1   : > { %v1210_v25 = vadd.f32 %v5326_v21, %v1209_v24 }
 0x1c2   : > { %v1529_v31 = vmax.f32 %v1215_v23, 0.0 }
 0x1c3   : > { %v1528_v28 = vmax.f32 %v1210_v25, 0.0  ;;  %v4251_v29 = vpop.f32.mrb[2].mxu1 }
 0x1c4   : > { %v1225_v32 = vadd.f32 %v4251_v29, %v5326_v21  ;;  %v1219_v33 = vpop.f32.mrb[3].mxu1 }
 0x1c5   : > { %v1220_v34 = vadd.f32 %v5326_v21, %v1219_v33  ;;  %4350 = vmatprep.mubr.msk.f32.mxu0 %vm950_vm1, %v1528_v28 }
 0x1c6   : > { %4351 = vmatmul.mubr.msk.f32.vlgmr.msra.gmra.mrb[64].mxu0 %vm950_vm1, %v1529_v31  ;;  %v1531_v37 = vmax.f32 %v1225_v32, 0.0 }
 0x1c7   : > { %v1530_v35 = vmax.f32 %v1220_v34, 0.0  ;;  %v4254_v36 = vpop.f32.mrb[4].mxu1 }
 0x1c8   : > { %v1235_v38 = vadd.f32 %v4254_v36, %v5326_v21  ;;  %v1229_v39 = vpop.f32.mrb[5].mxu1 }
 0x1c9   : > { %v1230_v40 = vadd.f32 %v5326_v21, %v1229_v39  ;;  %4353 = vmatprep.mubr.msk.f32.mxu0 %vm950_vm1, %v1530_v35 }
 0x1ca   : > { %4354 = vmatmul.mubr.msk.f32.gmra.mrb[66].mxu0 %vm950_vm1, %v1531_v37  ;;  %v1533_v43 = vmax.f32 %v1235_v38, 0.0 }
 0x1cb   : > { %v1532_v41 = vmax.f32 %v1230_v40, 0.0  ;;  %v4257_v42 = vpop.f32.mrb[6].mxu1 }
 0x1cc   : > { %v1245_v44 = vadd.f32 %v4257_v42, %v5326_v21  ;;  %v1239_v45 = vpop.f32.mrb[7].mxu1 }
 0x1cd   : > { %v1240_v46 = vadd.f32 %v5326_v21, %v1239_v45  ;;  %4356 = vmatprep.mubr.msk.f32.mxu0 %vm950_vm1, %v1532_v41 }
 0x1ce   : > { %4357 = vmatmul.mubr.msk.f32.gmra.mrb[68].mxu0 %vm950_vm1, %v1533_v43  ;;  %v1535_v49 = vmax.f32 %v1245_v44, 0.0 }
 0x1cf   : > { %v1534_v47 = vmax.f32 %v1240_v46, 0.0  ;;  %v4260_v48 = vpop.f32.mrb[8].mxu1 }
 0x1d0   : > { %v1255_v50 = vadd.f32 %v4260_v48, %v5326_v21  ;;  %v1249_v51 = vpop.f32.mrb[9].mxu1 }
 0x1d1   : > { %v1250_v52 = vadd.f32 %v5326_v21, %v1249_v51  ;;  %4359 = vmatprep.mubr.msk.f32.mxu0 %vm950_vm1, %v1534_v47 }
 0x1d2   : > { %4360 = vmatmul.mubr.msk.f32.gmra.mrb[70].mxu0 %vm950_vm1, %v1535_v49  ;;  %v1537_v55 = vmax.f32 %v1255_v50, 0.0 }
 0x1d3   : > { %v1536_v53 = vmax.f32 %v1250_v52, 0.0  ;;  %v4263_v54 = vpop.f32.mrb[10].mxu1 }
 0x1d4   : > { %v1265_v56 = vadd.f32 %v4263_v54, %v5326_v21  ;;  %v1259_v57 = vpop.f32.mrb[11].mxu1 }
 0x1d5   : > { %v1260_v58 = vadd.f32 %v5326_v21, %v1259_v57  ;;  %4362 = vmatprep.mubr.msk.f32.mxu0 %vm950_vm1, %v1536_v53 }
 0x1d6   : > { %4363 = vmatmul.mubr.msk.f32.gmra.mrb[72].mxu0 %vm950_vm1, %v1537_v55  ;;  %v1539_v61 = vmax.f32 %v1265_v56, 0.0 }
 0x1d7   : > { %v1538_v59 = vmax.f32 %v1260_v58, 0.0  ;;  %v4266_v60 = vpop.f32.mrb[12].mxu1 }
 0x1d8   : > { %v1275_v62 = vadd.f32 %v4266_v60, %v5326_v21  ;;  %v1269_v63 = vpop.f32.mrb[13].mxu1 }
 0x1d9   : > { %v1270_v0 = vadd.f32 %v5326_v21, %v1269_v63  ;;  %4365 = vmatprep.mubr.msk.f32.mxu0 %vm950_vm1, %v1538_v59 }
 0x1da   : > { %4366 = vmatmul.mubr.msk.f32.gmra.mrb[74].mxu0 %vm950_vm1, %v1539_v61  ;;  %v1541_v3 = vmax.f32 %v1275_v62, 0.0 }
 0x1db   : > { %v1540_v1 = vmax.f32 %v1270_v0, 0.0  ;;  %v4269_v2 = vpop.f32.mrb[14].mxu1 }
 0x1dc   : > { %v1285_v4 = vadd.f32 %v4269_v2, %v5326_v21  ;;  %v1279_v5 = vpop.f32.mrb[15].mxu1 }
 0x1dd   : > { %v1280_v6 = vadd.f32 %v5326_v21, %v1279_v5  ;;  %4368 = vmatprep.mubr.msk.f32.mxu0 %vm950_vm1, %v1540_v1 }
 0x1de   : > { %4369 = vmatmul.mubr.msk.f32.gmra.mrb[76].mxu0 %vm950_vm1, %v1541_v3  ;;  %v1543_v9 = vmax.f32 %v1285_v4, 0.0 }
 0x1df   : > { %v1542_v7 = vmax.f32 %v1280_v6, 0.0  ;;  %v4272_v8 = vpop.f32.mrb[16].mxu1 }
 0x1e0   : > { %v1295_v10 = vadd.f32 %v4272_v8, %v5326_v21  ;;  %v1289_v11 = vpop.f32.mrb[17].mxu1 }
 0x1e1   : > { %v1290_v13 = vadd.f32 %v5326_v21, %v1289_v11  ;;  %4371 = vmatprep.mubr.msk.f32.mxu0 %vm950_vm1, %v1542_v7 }
 0x1e2   : > { %4372 = vmatmul.mubr.msk.f32.gmra.mrb[78].mxu0 %vm950_vm1, %v1543_v9  ;;  %v1545_v16 = vmax.f32 %v1295_v10, 0.0 }
 0x1e3   : > { %v1544_v14 = vmax.f32 %v1290_v13, 0.0  ;;  %v4275_v15 = vpop.f32.mrb[18].mxu1 }
 0x1e4   : > { %v1305_v17 = vadd.f32 %v4275_v15, %v5326_v21  ;;  %v1299_v18 = vpop.f32.mrb[19].mxu1 }
 0x1e5   : > { %v1300_v19 = vadd.f32 %v5326_v21, %v1299_v18  ;;  %4374 = vmatprep.mubr.msk.f32.mxu0 %vm950_vm1, %v1544_v14 }
 0x1e6   : > { %4375 = vmatmul.mubr.msk.f32.gmra.mrb[80].mxu0 %vm950_vm1, %v1545_v16  ;;  %v1547_v22 = vmax.f32 %v1305_v17, 0.0 }
 0x1e7   : > { %v1546_v12 = vmax.f32 %v1300_v19, 0.0  ;;  %v4278_v20 = vpop.f32.mrb[20].mxu1 }
 0x1e8   : > { %v1315_v23 = vadd.f32 %v4278_v20, %v5326_v21  ;;  %v1309_v24 = vpop.f32.mrb[21].mxu1 }
 0x1e9   : > { %v1310_v25 = vadd.f32 %v5326_v21, %v1309_v24  ;;  %4377 = vmatprep.mubr.msk.f32.mxu0 %vm950_vm1, %v1546_v12 }
 0x1ea   : > { %4378 = vmatmul.mubr.msk.f32.gmra.mrb[82].mxu0 %vm950_vm1, %v1547_v22  ;;  %v1549_v28 = vmax.f32 %v1315_v23, 0.0 }
 0x1eb   : > { %v1548_v26 = vmax.f32 %v1310_v25, 0.0  ;;  %v4281_v27 = vpop.f32.mrb[22].mxu1 }
 0x1ec   : > { %v1325_v29 = vadd.f32 %v4281_v27, %v5326_v21  ;;  %v1319_v30 = vpop.f32.mrb[23].mxu1 }
 0x1ed   : > { %v1320_v31 = vadd.f32 %v5326_v21, %v1319_v30  ;;  %4380 = vmatprep.mubr.msk.f32.mxu0 %vm950_vm1, %v1548_v26 }
 0x1ee   : > { %4381 = vmatmul.mubr.msk.f32.gmra.mrb[84].mxu0 %vm950_vm1, %v1549_v28  ;;  %v1551_v34 = vmax.f32 %v1325_v29, 0.0 }
 0x1ef   : > { %v1550_v32 = vmax.f32 %v1320_v31, 0.0  ;;  %v4284_v33 = vpop.f32.mrb[24].mxu1 }
 0x1f0   : > { %v1335_v35 = vadd.f32 %v4284_v33, %v5326_v21  ;;  %v1329_v36 = vpop.f32.mrb[25].mxu1 }
 0x1f1   : > { %v1330_v37 = vadd.f32 %v5326_v21, %v1329_v36  ;;  %4383 = vmatprep.mubr.msk.f32.mxu0 %vm950_vm1, %v1550_v32 }
 0x1f2   : > { %4384 = vmatmul.mubr.msk.f32.gmra.mrb[86].mxu0 %vm950_vm1, %v1551_v34  ;;  %v1553_v40 = vmax.f32 %v1335_v35, 0.0 }
 0x1f3   : > { %v1552_v38 = vmax.f32 %v1330_v37, 0.0  ;;  %v4287_v39 = vpop.f32.mrb[26].mxu1 }
 0x1f4   : > { %v1345_v41 = vadd.f32 %v4287_v39, %v5326_v21  ;;  %v1339_v42 = vpop.f32.mrb[27].mxu1 }
 0x1f5   : > { %v1340_v43 = vadd.f32 %v5326_v21, %v1339_v42  ;;  %4386 = vmatprep.mubr.msk.f32.mxu0 %vm950_vm1, %v1552_v38 }
 0x1f6   : > { %4387 = vmatmul.mubr.msk.f32.gmra.mrb[88].mxu0 %vm950_vm1, %v1553_v40  ;;  %v1555_v46 = vmax.f32 %v1345_v41, 0.0 }
 0x1f7   : > { %v1554_v44 = vmax.f32 %v1340_v43, 0.0  ;;  %v4290_v45 = vpop.f32.mrb[28].mxu1 }
 0x1f8   : > { %v1355_v47 = vadd.f32 %v4290_v45, %v5326_v21  ;;  %v1349_v48 = vpop.f32.mrb[29].mxu1 }
 0x1f9   : > { %v1350_v49 = vadd.f32 %v5326_v21, %v1349_v48  ;;  %4389 = vmatprep.mubr.msk.f32.mxu0 %vm950_vm1, %v1554_v44 }
 0x1fa   : > { %4390 = vmatmul.mubr.msk.f32.gmra.mrb[90].mxu0 %vm950_vm1, %v1555_v46  ;;  %v1557_v52 = vmax.f32 %v1355_v47, 0.0 }
 0x1fb   : > { %v1556_v50 = vmax.f32 %v1350_v49, 0.0  ;;  %v4293_v51 = vpop.f32.mrb[30].mxu1 }
 0x1fc   : > { %v1365_v53 = vadd.f32 %v4293_v51, %v5326_v21  ;;  %v1359_v54 = vpop.f32.mrb[31].mxu1 }
 0x1fd   : > { %v1360_v55 = vadd.f32 %v5326_v21, %v1359_v54  ;;  %4392 = vmatprep.mubr.msk.f32.mxu0 %vm950_vm1, %v1556_v50 }
 0x1fe   : > { %4393 = vmatmul.mubr.msk.f32.gmra.mrb[92].mxu0 %vm950_vm1, %v1557_v52  ;;  %v1559_v58 = vmax.f32 %v1365_v53, 0.0 }
 0x1ff   : > { %v1558_v56 = vmax.f32 %v1360_v55, 0.0  ;;  %v4296_v57 = vpop.f32.mrb[32].mxu1 }
 0x200   : > { %v1375_v59 = vadd.f32 %v4296_v57, %v5326_v21  ;;  %v1369_v60 = vpop.f32.mrb[33].mxu1 }
 0x201   : > { %v1370_v61 = vadd.f32 %v5326_v21, %v1369_v60  ;;  %4395 = vmatprep.mubr.msk.f32.mxu0 %vm950_vm1, %v1558_v56 }
 0x202   : > { %4396 = vmatmul.mubr.msk.f32.gmra.mrb[94].mxu0 %vm950_vm1, %v1559_v58  ;;  %v1561_v0 = vmax.f32 %v1375_v59, 0.0 }
 0x203   : > { %v1560_v62 = vmax.f32 %v1370_v61, 0.0  ;;  %v4299_v63 = vpop.f32.mrb[34].mxu1 }
 0x204   : > { %v1385_v1 = vadd.f32 %v4299_v63, %v5326_v21  ;;  %v1379_v2 = vpop.f32.mrb[35].mxu1 }
 0x205   : > { %v1380_v3 = vadd.f32 %v5326_v21, %v1379_v2  ;;  %4398 = vmatprep.mubr.msk.f32.mxu0 %vm950_vm1, %v1560_v62 }
 0x206   : > { %4399 = vmatmul.mubr.msk.f32.gmra.mrb[96].mxu0 %vm950_vm1, %v1561_v0  ;;  %v1563_v6 = vmax.f32 %v1385_v1, 0.0 }
 0x207   : > { %v1562_v4 = vmax.f32 %v1380_v3, 0.0  ;;  %v4302_v5 = vpop.f32.mrb[36].mxu1 }
 0x208   : > { %v1395_v7 = vadd.f32 %v4302_v5, %v5326_v21  ;;  %v1389_v8 = vpop.f32.mrb[37].mxu1 }
 0x209   : > { %v1390_v9 = vadd.f32 %v5326_v21, %v1389_v8  ;;  %4401 = vmatprep.mubr.msk.f32.mxu0 %vm950_vm1, %v1562_v4 }
 0x20a   : > { %4402 = vmatmul.mubr.msk.f32.gmra.mrb[98].mxu0 %vm950_vm1, %v1563_v6  ;;  %v1565_v13 = vmax.f32 %v1395_v7, 0.0 }
 0x20b   : > { %v1564_v10 = vmax.f32 %v1390_v9, 0.0  ;;  %v4305_v11 = vpop.f32.mrb[38].mxu1 }
 0x20c   : > { %v1405_v14 = vadd.f32 %v4305_v11, %v5326_v21  ;;  %v1399_v15 = vpop.f32.mrb[39].mxu1 }
 0x20d   : > { %v1400_v16 = vadd.f32 %v5326_v21, %v1399_v15  ;;  %4404 = vmatprep.mubr.msk.f32.mxu0 %vm950_vm1, %v1564_v10 }
 0x20e   : > { %4405 = vmatmul.mubr.msk.f32.gmra.mrb[100].mxu0 %vm950_vm1, %v1565_v13  ;;  %v1567_v19 = vmax.f32 %v1405_v14, 0.0 }
 0x20f   : > { %v1566_v17 = vmax.f32 %v1400_v16, 0.0  ;;  %v4308_v18 = vpop.f32.mrb[40].mxu1 }
 0x210   : > { %v1415_v12 = vadd.f32 %v4308_v18, %v5326_v21  ;;  %v1409_v20 = vpop.f32.mrb[41].mxu1 }
 0x211   : > { %v1410_v22 = vadd.f32 %v5326_v21, %v1409_v20  ;;  %4407 = vmatprep.mubr.msk.f32.mxu0 %vm950_vm1, %v1566_v17 }
 0x212   : > { %4408 = vmatmul.mubr.msk.f32.gmra.mrb[102].mxu0 %vm950_vm1, %v1567_v19  ;;  %v1569_v25 = vmax.f32 %v1415_v12, 0.0 }
 0x213   : > { %v1568_v23 = vmax.f32 %v1410_v22, 0.0  ;;  %v4311_v24 = vpop.f32.mrb[42].mxu1 }
 0x214   : > { %v1425_v26 = vadd.f32 %v4311_v24, %v5326_v21  ;;  %v1419_v27 = vpop.f32.mrb[43].mxu1 }
 0x215   : > { %v1420_v28 = vadd.f32 %v5326_v21, %v1419_v27  ;;  %4410 = vmatprep.mubr.msk.f32.mxu0 %vm950_vm1, %v1568_v23 }
 0x216   : > { %4411 = vmatmul.mubr.msk.f32.gmra.mrb[104].mxu0 %vm950_vm1, %v1569_v25  ;;  %v1571_v31 = vmax.f32 %v1425_v26, 0.0 }
 0x217   : > { %v1570_v29 = vmax.f32 %v1420_v28, 0.0  ;;  %v4314_v30 = vpop.f32.mrb[44].mxu1  ;;  %v5465_v28 = vld [vmem:[%s5938_s1 + $0x2] ss:$0 sm:$0xff] }
 0x218   : > { %v1435_v32 = vadd.f32 %v4314_v30, %v5326_v21  ;;  %v1429_v33 = vpop.f32.mrb[45].mxu1 }
 0x219   : > { %v1430_v34 = vadd.f32 %v5326_v21, %v1429_v33  ;;  %4413 = vmatprep.mubr.msk.f32.mxu0 %vm950_vm1, %v1570_v29 }
 0x21a   : > { %4414 = vmatmul.mubr.msk.f32.gmra.mrb[106].mxu0 %vm950_vm1, %v1571_v31  ;;  %v1573_v37 = vmax.f32 %v1435_v32, 0.0 }
 0x21b   : > { %v1572_v35 = vmax.f32 %v1430_v34, 0.0  ;;  %v4317_v36 = vpop.f32.mrb[46].mxu1 }
 0x21c   : > { %v1445_v38 = vadd.f32 %v4317_v36, %v5326_v21  ;;  %v1439_v39 = vpop.f32.mrb[47].mxu1 }
 0x21d   : > { %v1440_v40 = vadd.f32 %v5326_v21, %v1439_v39  ;;  %4416 = vmatprep.mubr.msk.f32.mxu0 %vm950_vm1, %v1572_v35 }
 0x21e   : > { %4417 = vmatmul.mubr.msk.f32.gmra.mrb[108].mxu0 %vm950_vm1, %v1573_v37  ;;  %v1575_v43 = vmax.f32 %v1445_v38, 0.0 }
 0x21f   : > { %v1574_v41 = vmax.f32 %v1440_v40, 0.0  ;;  %v4320_v42 = vpop.f32.mrb[48].mxu1 }
 0x220   : > { %v1455_v44 = vadd.f32 %v4320_v42, %v5326_v21  ;;  %v1449_v45 = vpop.f32.mrb[49].mxu1 }
 0x221   : > { %v1450_v46 = vadd.f32 %v5326_v21, %v1449_v45  ;;  %4419 = vmatprep.mubr.msk.f32.mxu0 %vm950_vm1, %v1574_v41 }
 0x222   : > { %4420 = vmatmul.mubr.msk.f32.gmra.mrb[110].mxu0 %vm950_vm1, %v1575_v43  ;;  %v1577_v49 = vmax.f32 %v1455_v44, 0.0 }
 0x223   : > { %v1576_v47 = vmax.f32 %v1450_v46, 0.0  ;;  %v4323_v48 = vpop.f32.mrb[50].mxu1 }
 0x224   : > { %v1465_v50 = vadd.f32 %v4323_v48, %v5326_v21  ;;  %v1459_v51 = vpop.f32.mrb[51].mxu1 }
 0x225   : > { %v1460_v52 = vadd.f32 %v5326_v21, %v1459_v51  ;;  %4422 = vmatprep.mubr.msk.f32.mxu0 %vm950_vm1, %v1576_v47 }
 0x226   : > { %4423 = vmatmul.mubr.msk.f32.gmra.mrb[112].mxu0 %vm950_vm1, %v1577_v49  ;;  %v1579_v55 = vmax.f32 %v1465_v50, 0.0 }
 0x227   : > { %v1578_v53 = vmax.f32 %v1460_v52, 0.0  ;;  %v4326_v54 = vpop.f32.mrb[52].mxu1 }
 0x228   : > { %v1475_v56 = vadd.f32 %v4326_v54, %v5326_v21  ;;  %v1469_v57 = vpop.f32.mrb[53].mxu1 }
 0x229   : > { %v1470_v58 = vadd.f32 %v5326_v21, %v1469_v57  ;;  %4425 = vmatprep.mubr.msk.f32.mxu0 %vm950_vm1, %v1578_v53 }
 0x22a   : > { %4426 = vmatmul.mubr.msk.f32.gmra.mrb[114].mxu0 %vm950_vm1, %v1579_v55  ;;  %v1581_v61 = vmax.f32 %v1475_v56, 0.0 }
 0x22b   : > { %v1580_v59 = vmax.f32 %v1470_v58, 0.0  ;;  %v4329_v60 = vpop.f32.mrb[54].mxu1 }
 0x22c   : > { %v1485_v62 = vadd.f32 %v4329_v60, %v5326_v21  ;;  %v1479_v63 = vpop.f32.mrb[55].mxu1 }
 0x22d   : > { %v1480_v0 = vadd.f32 %v5326_v21, %v1479_v63  ;;  %4428 = vmatprep.mubr.msk.f32.mxu0 %vm950_vm1, %v1580_v59 }
 0x22e   : > { %4429 = vmatmul.mubr.msk.f32.gmra.mrb[116].mxu0 %vm950_vm1, %v1581_v61  ;;  %v1583_v3 = vmax.f32 %v1485_v62, 0.0 }
 0x22f   : > { %v1582_v1 = vmax.f32 %v1480_v0, 0.0  ;;  %v4332_v2 = vpop.f32.mrb[56].mxu1 }
 0x230   : > { %v1495_v4 = vadd.f32 %v4332_v2, %v5326_v21  ;;  %v1489_v5 = vpop.f32.mrb[57].mxu1 }
 0x231   : > { %v1490_v6 = vadd.f32 %v5326_v21, %v1489_v5  ;;  %4431 = vmatprep.mubr.msk.f32.mxu0 %vm950_vm1, %v1582_v1 }
 0x232   : > { %4432 = vmatmul.mubr.msk.f32.gmra.mrb[118].mxu0 %vm950_vm1, %v1583_v3  ;;  %v1585_v9 = vmax.f32 %v1495_v4, 0.0 }
 0x233   : > { %v1584_v7 = vmax.f32 %v1490_v6, 0.0  ;;  %v4335_v8 = vpop.f32.mrb[58].mxu1 }
 0x234   : > { %v1505_v10 = vadd.f32 %v4335_v8, %v5326_v21  ;;  %v1499_v11 = vpop.f32.mrb[59].mxu1 }
 0x235   : > { %v1500_v13 = vadd.f32 %v5326_v21, %v1499_v11  ;;  %4434 = vmatprep.mubr.msk.f32.mxu0 %vm950_vm1, %v1584_v7 }
 0x236   : > { %4435 = vmatmul.mubr.msk.f32.gmra.mrb[120].mxu0 %vm950_vm1, %v1585_v9  ;;  %v1587_v16 = vmax.f32 %v1505_v10, 0.0 }
 0x237   : > { %v1586_v14 = vmax.f32 %v1500_v13, 0.0  ;;  %v4338_v15 = vpop.f32.mrb[60].mxu1 }
 0x238   : > { %v1515_v17 = vadd.f32 %v4338_v15, %v5326_v21  ;;  %v1509_v18 = vpop.f32.mrb[61].mxu1 }
 0x239   : > { %v1510_v19 = vadd.f32 %v5326_v21, %v1509_v18  ;;  %4437 = vmatprep.mubr.msk.f32.mxu0 %vm950_vm1, %v1586_v14 }
 0x23a   : > { %4438 = vmatmul.mubr.msk.f32.gmra.mrb[122].mxu0 %vm950_vm1, %v1587_v16  ;;  %v1589_v22 = vmax.f32 %v1515_v17, 0.0 }
 0x23b   : > { %v1588_v12 = vmax.f32 %v1510_v19, 0.0  ;;  %v4341_v20 = vpop.f32.mrb[62].mxu1 }
 0x23c   : > { %v1525_v23 = vadd.f32 %v4341_v20, %v5326_v21  ;;  %v1519_v24 = vpop.f32.mrb[63].mxu1 }
 0x23d   : > { %v1520_v25 = vadd.f32 %v5326_v21, %v1519_v24  ;;  %4440 = vmatprep.mubr.msk.f32.mxu0 %vm950_vm1, %v1588_v12 }
 0x23e   : > { %4441 = vmatmul.mubr.msk.f32.gmra.mrb[124].mxu0 %vm950_vm1, %v1589_v22  ;;  %v1591_v27 = vmax.f32 %v1525_v23, 0.0 }
 0x23f   : > { %v1590_v26 = vmax.f32 %v1520_v25, 0.0 }
 0x241   : > { %4443 = vmatprep.mubr.msk.f32.mxu0 %vm950_vm1, %v1590_v26 }
 0x242   : > { %4444 = vmatmul.mubr.msk.f32.gmra.mrb[126].mxu0 %vm950_vm1, %v1591_v27 }
 0x299   : > { %v4352_v29 = vpop.f32.mrb[64].mxu0 }
 0x29a   : > { %v1865_v30 = vadd.f32 %v4352_v29, %v5465_v28  ;;  %v1859_v31 = vpop.f32.mrb[65].mxu0 }
 0x29b   : > { %v1860_v21 = vadd.f32 %v5465_v28, %v1859_v31 }
 0x29c   : > { %v2179_v32 = vmax.f32 %v1865_v30, 0.0 }
 0x29d   : > { %v2178_v33 = vmax.f32 %v1860_v21, 0.0  ;;  %v4355_v34 = vpop.f32.mrb[66].mxu0 }
 0x29e   : > { %3278 = vst.msk [vmem:[%s5472_s11 + $0x8] sm:$0xff] %vm950_vm1, %v2179_v32  ;;  %v1875_v35 = vadd.f32 %v4355_v34, %v5465_v28  ;;  %v1869_v36 = vpop.f32.mrb[67].mxu0 }
 0x29f   : > { %3277 = vst.msk [vmem:[%s5472_s11] sm:$0xff] %vm950_vm1, %v2178_v33  ;;  %v1870_v37 = vadd.f32 %v5465_v28, %v1869_v36  ;;  %4454 = vmatprep.mubr.msk.f32.mxu1 %vm950_vm1, %v2178_v33 }
 0x2a0   : > { %v2181_v38 = vmax.f32 %v1875_v35, 0.0  ;;  %4455 = vmatmul.mubr.msk.f32.vlgmr.msra.gmra.mrb[64].mxu1 %vm950_vm1, %v2179_v32 }
 0x2a1   : > { %v2180_v39 = vmax.f32 %v1870_v37, 0.0  ;;  %v4358_v40 = vpop.f32.mrb[68].mxu0 }
 0x2a2   : > { %3280 = vst.msk [vmem:[%s5472_s11 + $0x18] sm:$0xff] %vm950_vm1, %v2181_v38  ;;  %v1885_v41 = vadd.f32 %v4358_v40, %v5465_v28  ;;  %v1879_v42 = vpop.f32.mrb[69].mxu0 }
 0x2a3   : > { %3279 = vst.msk [vmem:[%s5472_s11 + $0x10] sm:$0xff] %vm950_vm1, %v2180_v39  ;;  %v1880_v43 = vadd.f32 %v5465_v28, %v1879_v42  ;;  %4457 = vmatprep.mubr.msk.f32.mxu1 %vm950_vm1, %v2180_v39 }
 0x2a4   : > { %v2183_v44 = vmax.f32 %v1885_v41, 0.0  ;;  %4458 = vmatmul.mubr.msk.f32.gmra.mrb[66].mxu1 %vm950_vm1, %v2181_v38 }
 0x2a5   : > { %v2182_v45 = vmax.f32 %v1880_v43, 0.0  ;;  %v4361_v46 = vpop.f32.mrb[70].mxu0 }
 0x2a6   : > { %3282 = vst.msk [vmem:[%s5472_s11 + $0x28] sm:$0xff] %vm950_vm1, %v2183_v44  ;;  %v1895_v47 = vadd.f32 %v4361_v46, %v5465_v28  ;;  %v1889_v48 = vpop.f32.mrb[71].mxu0 }
 0x2a7   : > { %3281 = vst.msk [vmem:[%s5472_s11 + $0x20] sm:$0xff] %vm950_vm1, %v2182_v45  ;;  %v1890_v49 = vadd.f32 %v5465_v28, %v1889_v48  ;;  %4460 = vmatprep.mubr.msk.f32.mxu1 %vm950_vm1, %v2182_v45 }
 0x2a8   : > { %v2185_v50 = vmax.f32 %v1895_v47, 0.0  ;;  %4461 = vmatmul.mubr.msk.f32.gmra.mrb[68].mxu1 %vm950_vm1, %v2183_v44 }
 0x2a9   : > { %v2184_v51 = vmax.f32 %v1890_v49, 0.0  ;;  %v4364_v52 = vpop.f32.mrb[72].mxu0 }
 0x2aa   : > { %3284 = vst.msk [vmem:[%s5472_s11 + $0x38] sm:$0xff] %vm950_vm1, %v2185_v50  ;;  %v1905_v53 = vadd.f32 %v4364_v52, %v5465_v28  ;;  %v1899_v54 = vpop.f32.mrb[73].mxu0 }
 0x2ab   : > { %3283 = vst.msk [vmem:[%s5472_s11 + $0x30] sm:$0xff] %vm950_vm1, %v2184_v51  ;;  %v1900_v55 = vadd.f32 %v5465_v28, %v1899_v54  ;;  %4463 = vmatprep.mubr.msk.f32.mxu1 %vm950_vm1, %v2184_v51 }
 0x2ac   : > { %v2187_v56 = vmax.f32 %v1905_v53, 0.0  ;;  %4464 = vmatmul.mubr.msk.f32.gmra.mrb[70].mxu1 %vm950_vm1, %v2185_v50 }
 0x2ad   : > { %v2186_v57 = vmax.f32 %v1900_v55, 0.0  ;;  %v4367_v58 = vpop.f32.mrb[74].mxu0 }
 0x2ae   : > { %3286 = vst.msk [vmem:[%s5472_s11 + $0x48] sm:$0xff] %vm950_vm1, %v2187_v56  ;;  %v1915_v59 = vadd.f32 %v4367_v58, %v5465_v28  ;;  %v1909_v60 = vpop.f32.mrb[75].mxu0 }
 0x2af   : > { %3285 = vst.msk [vmem:[%s5472_s11 + $0x40] sm:$0xff] %vm950_vm1, %v2186_v57  ;;  %v1910_v61 = vadd.f32 %v5465_v28, %v1909_v60  ;;  %4466 = vmatprep.mubr.msk.f32.mxu1 %vm950_vm1, %v2186_v57 }
 0x2b0   : > { %v2189_v62 = vmax.f32 %v1915_v59, 0.0  ;;  %4467 = vmatmul.mubr.msk.f32.gmra.mrb[72].mxu1 %vm950_vm1, %v2187_v56 }
 0x2b1   : > { %v2188_v63 = vmax.f32 %v1910_v61, 0.0  ;;  %v4370_v0 = vpop.f32.mrb[76].mxu0 }
 0x2b2   : > { %3288 = vst.msk [vmem:[%s5472_s11 + $0x58] sm:$0xff] %vm950_vm1, %v2189_v62  ;;  %v1925_v1 = vadd.f32 %v4370_v0, %v5465_v28  ;;  %v1919_v2 = vpop.f32.mrb[77].mxu0 }
 0x2b3   : > { %3287 = vst.msk [vmem:[%s5472_s11 + $0x50] sm:$0xff] %vm950_vm1, %v2188_v63  ;;  %v1920_v3 = vadd.f32 %v5465_v28, %v1919_v2  ;;  %4469 = vmatprep.mubr.msk.f32.mxu1 %vm950_vm1, %v2188_v63 }
 0x2b4   : > { %v2191_v4 = vmax.f32 %v1925_v1, 0.0  ;;  %4470 = vmatmul.mubr.msk.f32.gmra.mrb[74].mxu1 %vm950_vm1, %v2189_v62 }
 0x2b5   : > { %v2190_v5 = vmax.f32 %v1920_v3, 0.0  ;;  %v4373_v6 = vpop.f32.mrb[78].mxu0 }
 0x2b6   : > { %3290 = vst.msk [vmem:[%s5472_s11 + $0x68] sm:$0xff] %vm950_vm1, %v2191_v4  ;;  %v1935_v7 = vadd.f32 %v4373_v6, %v5465_v28  ;;  %v1929_v8 = vpop.f32.mrb[79].mxu0 }
 0x2b7   : > { %3289 = vst.msk [vmem:[%s5472_s11 + $0x60] sm:$0xff] %vm950_vm1, %v2190_v5  ;;  %v1930_v9 = vadd.f32 %v5465_v28, %v1929_v8  ;;  %4472 = vmatprep.mubr.msk.f32.mxu1 %vm950_vm1, %v2190_v5 }
 0x2b8   : > { %v2193_v10 = vmax.f32 %v1935_v7, 0.0  ;;  %4473 = vmatmul.mubr.msk.f32.gmra.mrb[76].mxu1 %vm950_vm1, %v2191_v4 }
 0x2b9   : > { %v2192_v11 = vmax.f32 %v1930_v9, 0.0  ;;  %v4376_v13 = vpop.f32.mrb[80].mxu0 }
 0x2ba   : > { %3292 = vst.msk [vmem:[%s5472_s11 + $0x78] sm:$0xff] %vm950_vm1, %v2193_v10  ;;  %v1945_v14 = vadd.f32 %v4376_v13, %v5465_v28  ;;  %v1939_v15 = vpop.f32.mrb[81].mxu0 }
 0x2bb   : > { %3291 = vst.msk [vmem:[%s5472_s11 + $0x70] sm:$0xff] %vm950_vm1, %v2192_v11  ;;  %v1940_v16 = vadd.f32 %v5465_v28, %v1939_v15  ;;  %4475 = vmatprep.mubr.msk.f32.mxu1 %vm950_vm1, %v2192_v11 }
 0x2bc   : > { %v2195_v17 = vmax.f32 %v1945_v14, 0.0  ;;  %4476 = vmatmul.mubr.msk.f32.gmra.mrb[78].mxu1 %vm950_vm1, %v2193_v10 }
 0x2bd   : > { %v2194_v18 = vmax.f32 %v1940_v16, 0.0  ;;  %v4379_v19 = vpop.f32.mrb[82].mxu0 }
 0x2be   : > { %3294 = vst.msk [vmem:[%s5472_s11 + $0x88] sm:$0xff] %vm950_vm1, %v2195_v17  ;;  %v1955_v12 = vadd.f32 %v4379_v19, %v5465_v28  ;;  %v1949_v20 = vpop.f32.mrb[83].mxu0 }
 0x2bf   : > { %3293 = vst.msk [vmem:[%s5472_s11 + $0x80] sm:$0xff] %vm950_vm1, %v2194_v18  ;;  %v1950_v22 = vadd.f32 %v5465_v28, %v1949_v20  ;;  %4478 = vmatprep.mubr.msk.f32.mxu1 %vm950_vm1, %v2194_v18 }
 0x2c0   : > { %v2197_v23 = vmax.f32 %v1955_v12, 0.0  ;;  %4479 = vmatmul.mubr.msk.f32.gmra.mrb[80].mxu1 %vm950_vm1, %v2195_v17 }
 0x2c1   : > { %v2196_v24 = vmax.f32 %v1950_v22, 0.0  ;;  %v4382_v25 = vpop.f32.mrb[84].mxu0 }
 0x2c2   : > { %3296 = vst.msk [vmem:[%s5472_s11 + $0x98] sm:$0xff] %vm950_vm1, %v2197_v23  ;;  %v1965_v26 = vadd.f32 %v4382_v25, %v5465_v28  ;;  %v1959_v27 = vpop.f32.mrb[85].mxu0 }
 0x2c3   : > { %3295 = vst.msk [vmem:[%s5472_s11 + $0x90] sm:$0xff] %vm950_vm1, %v2196_v24  ;;  %v1960_v29 = vadd.f32 %v5465_v28, %v1959_v27  ;;  %4481 = vmatprep.mubr.msk.f32.mxu1 %vm950_vm1, %v2196_v24 }
 0x2c4   : > { %v2199_v30 = vmax.f32 %v1965_v26, 0.0  ;;  %4482 = vmatmul.mubr.msk.f32.gmra.mrb[82].mxu1 %vm950_vm1, %v2197_v23 }
 0x2c5   : > { %v2198_v31 = vmax.f32 %v1960_v29, 0.0  ;;  %v4385_v21 = vpop.f32.mrb[86].mxu0 }
 0x2c6   : > { %3298 = vst.msk [vmem:[%s5472_s11 + $0xa8] sm:$0xff] %vm950_vm1, %v2199_v30  ;;  %v1975_v32 = vadd.f32 %v4385_v21, %v5465_v28  ;;  %v1969_v33 = vpop.f32.mrb[87].mxu0 }
 0x2c7   : > { %3297 = vst.msk [vmem:[%s5472_s11 + $0xa0] sm:$0xff] %vm950_vm1, %v2198_v31  ;;  %v1970_v34 = vadd.f32 %v5465_v28, %v1969_v33  ;;  %4484 = vmatprep.mubr.msk.f32.mxu1 %vm950_vm1, %v2198_v31 }
 0x2c8   : > { %v2201_v35 = vmax.f32 %v1975_v32, 0.0  ;;  %4485 = vmatmul.mubr.msk.f32.gmra.mrb[84].mxu1 %vm950_vm1, %v2199_v30 }
 0x2c9   : > { %v2200_v36 = vmax.f32 %v1970_v34, 0.0  ;;  %v4388_v37 = vpop.f32.mrb[88].mxu0 }
 0x2ca   : > { %3300 = vst.msk [vmem:[%s5472_s11 + $0xb8] sm:$0xff] %vm950_vm1, %v2201_v35  ;;  %v1985_v38 = vadd.f32 %v4388_v37, %v5465_v28  ;;  %v1979_v39 = vpop.f32.mrb[89].mxu0 }
 0x2cb   : > { %3299 = vst.msk [vmem:[%s5472_s11 + $0xb0] sm:$0xff] %vm950_vm1, %v2200_v36  ;;  %v1980_v40 = vadd.f32 %v5465_v28, %v1979_v39  ;;  %4487 = vmatprep.mubr.msk.f32.mxu1 %vm950_vm1, %v2200_v36 }
 0x2cc   : > { %v2203_v41 = vmax.f32 %v1985_v38, 0.0  ;;  %4488 = vmatmul.mubr.msk.f32.gmra.mrb[86].mxu1 %vm950_vm1, %v2201_v35 }
 0x2cd   : > { %v2202_v42 = vmax.f32 %v1980_v40, 0.0  ;;  %v4391_v43 = vpop.f32.mrb[90].mxu0 }
 0x2ce   : > { %3302 = vst.msk [vmem:[%s5472_s11 + $0xc8] sm:$0xff] %vm950_vm1, %v2203_v41  ;;  %v1995_v44 = vadd.f32 %v4391_v43, %v5465_v28  ;;  %v1989_v45 = vpop.f32.mrb[91].mxu0 }
 0x2cf   : > { %3301 = vst.msk [vmem:[%s5472_s11 + $0xc0] sm:$0xff] %vm950_vm1, %v2202_v42  ;;  %v1990_v46 = vadd.f32 %v5465_v28, %v1989_v45  ;;  %4490 = vmatprep.mubr.msk.f32.mxu1 %vm950_vm1, %v2202_v42 }
 0x2d0   : > { %v2205_v47 = vmax.f32 %v1995_v44, 0.0  ;;  %4491 = vmatmul.mubr.msk.f32.gmra.mrb[88].mxu1 %vm950_vm1, %v2203_v41 }
 0x2d1   : > { %v2204_v48 = vmax.f32 %v1990_v46, 0.0  ;;  %v4394_v49 = vpop.f32.mrb[92].mxu0 }
 0x2d2   : > { %3304 = vst.msk [vmem:[%s5472_s11 + $0xd8] sm:$0xff] %vm950_vm1, %v2205_v47  ;;  %v2005_v50 = vadd.f32 %v4394_v49, %v5465_v28  ;;  %v1999_v51 = vpop.f32.mrb[93].mxu0 }
 0x2d3   : > { %3303 = vst.msk [vmem:[%s5472_s11 + $0xd0] sm:$0xff] %vm950_vm1, %v2204_v48  ;;  %v2000_v52 = vadd.f32 %v5465_v28, %v1999_v51  ;;  %4493 = vmatprep.mubr.msk.f32.mxu1 %vm950_vm1, %v2204_v48 }
 0x2d4   : > { %v2207_v53 = vmax.f32 %v2005_v50, 0.0  ;;  %4494 = vmatmul.mubr.msk.f32.gmra.mrb[90].mxu1 %vm950_vm1, %v2205_v47 }
 0x2d5   : > { %v2206_v54 = vmax.f32 %v2000_v52, 0.0  ;;  %v4397_v55 = vpop.f32.mrb[94].mxu0 }
 0x2d6   : > { %3306 = vst.msk [vmem:[%s5472_s11 + $0xe8] sm:$0xff] %vm950_vm1, %v2207_v53  ;;  %v2015_v56 = vadd.f32 %v4397_v55, %v5465_v28  ;;  %v2009_v57 = vpop.f32.mrb[95].mxu0 }
 0x2d7   : > { %3305 = vst.msk [vmem:[%s5472_s11 + $0xe0] sm:$0xff] %vm950_vm1, %v2206_v54  ;;  %v2010_v58 = vadd.f32 %v5465_v28, %v2009_v57  ;;  %4496 = vmatprep.mubr.msk.f32.mxu1 %vm950_vm1, %v2206_v54 }
 0x2d8   : > { %v2209_v59 = vmax.f32 %v2015_v56, 0.0  ;;  %4497 = vmatmul.mubr.msk.f32.gmra.mrb[92].mxu1 %vm950_vm1, %v2207_v53 }
 0x2d9   : > { %v2208_v60 = vmax.f32 %v2010_v58, 0.0  ;;  %v4400_v61 = vpop.f32.mrb[96].mxu0 }
 0x2da   : > { %3308 = vst.msk [vmem:[%s5472_s11 + $0xf8] sm:$0xff] %vm950_vm1, %v2209_v59  ;;  %v2025_v62 = vadd.f32 %v4400_v61, %v5465_v28  ;;  %v2019_v63 = vpop.f32.mrb[97].mxu0 }
 0x2db   : > { %3307 = vst.msk [vmem:[%s5472_s11 + $0xf0] sm:$0xff] %vm950_vm1, %v2208_v60  ;;  %v2020_v0 = vadd.f32 %v5465_v28, %v2019_v63  ;;  %4499 = vmatprep.mubr.msk.f32.mxu1 %vm950_vm1, %v2208_v60 }
 0x2dc   : > { %v2211_v1 = vmax.f32 %v2025_v62, 0.0  ;;  %4500 = vmatmul.mubr.msk.f32.gmra.mrb[94].mxu1 %vm950_vm1, %v2209_v59 }
 0x2dd   : > { %v2210_v2 = vmax.f32 %v2020_v0, 0.0  ;;  %v4403_v3 = vpop.f32.mrb[98].mxu0 }
 0x2de   : > { %3310 = vst.msk [vmem:[%s5472_s11 + $0x108] sm:$0xff] %vm950_vm1, %v2211_v1  ;;  %v2035_v4 = vadd.f32 %v4403_v3, %v5465_v28  ;;  %v2029_v5 = vpop.f32.mrb[99].mxu0 }
 0x2df   : > { %3309 = vst.msk [vmem:[%s5472_s11 + $0x100] sm:$0xff] %vm950_vm1, %v2210_v2  ;;  %v2030_v6 = vadd.f32 %v5465_v28, %v2029_v5  ;;  %4502 = vmatprep.mubr.msk.f32.mxu1 %vm950_vm1, %v2210_v2 }
 0x2e0   : > { %v2213_v7 = vmax.f32 %v2035_v4, 0.0  ;;  %4503 = vmatmul.mubr.msk.f32.gmra.mrb[96].mxu1 %vm950_vm1, %v2211_v1 }
 0x2e1   : > { %v2212_v8 = vmax.f32 %v2030_v6, 0.0  ;;  %v4406_v9 = vpop.f32.mrb[100].mxu0 }
 0x2e2   : > { %3312 = vst.msk [vmem:[%s5472_s11 + $0x118] sm:$0xff] %vm950_vm1, %v2213_v7  ;;  %v2045_v10 = vadd.f32 %v4406_v9, %v5465_v28  ;;  %v2039_v11 = vpop.f32.mrb[101].mxu0 }
 0x2e3   : > { %3311 = vst.msk [vmem:[%s5472_s11 + $0x110] sm:$0xff] %vm950_vm1, %v2212_v8  ;;  %v2040_v13 = vadd.f32 %v5465_v28, %v2039_v11  ;;  %4505 = vmatprep.mubr.msk.f32.mxu1 %vm950_vm1, %v2212_v8 }
 0x2e4   : > { %v2215_v14 = vmax.f32 %v2045_v10, 0.0  ;;  %4506 = vmatmul.mubr.msk.f32.gmra.mrb[98].mxu1 %vm950_vm1, %v2213_v7 }
 0x2e5   : > { %v2214_v15 = vmax.f32 %v2040_v13, 0.0  ;;  %v4409_v16 = vpop.f32.mrb[102].mxu0 }
 0x2e6   : > { %3314 = vst.msk [vmem:[%s5472_s11 + $0x128] sm:$0xff] %vm950_vm1, %v2215_v14  ;;  %v2055_v17 = vadd.f32 %v4409_v16, %v5465_v28  ;;  %v2049_v18 = vpop.f32.mrb[103].mxu0 }
 0x2e7   : > { %3313 = vst.msk [vmem:[%s5472_s11 + $0x120] sm:$0xff] %vm950_vm1, %v2214_v15  ;;  %v2050_v19 = vadd.f32 %v5465_v28, %v2049_v18  ;;  %4508 = vmatprep.mubr.msk.f32.mxu1 %vm950_vm1, %v2214_v15 }
 0x2e8   : > { %v2217_v12 = vmax.f32 %v2055_v17, 0.0  ;;  %4509 = vmatmul.mubr.msk.f32.gmra.mrb[100].mxu1 %vm950_vm1, %v2215_v14 }
 0x2e9   : > { %v2216_v20 = vmax.f32 %v2050_v19, 0.0  ;;  %v4412_v22 = vpop.f32.mrb[104].mxu0 }
 0x2ea   : > { %3316 = vst.msk [vmem:[%s5472_s11 + $0x138] sm:$0xff] %vm950_vm1, %v2217_v12  ;;  %v2065_v23 = vadd.f32 %v4412_v22, %v5465_v28  ;;  %v2059_v24 = vpop.f32.mrb[105].mxu0 }
 0x2eb   : > { %3315 = vst.msk [vmem:[%s5472_s11 + $0x130] sm:$0xff] %vm950_vm1, %v2216_v20  ;;  %v2060_v25 = vadd.f32 %v5465_v28, %v2059_v24  ;;  %4511 = vmatprep.mubr.msk.f32.mxu1 %vm950_vm1, %v2216_v20 }
 0x2ec   : > { %v2219_v26 = vmax.f32 %v2065_v23, 0.0  ;;  %4512 = vmatmul.mubr.msk.f32.gmra.mrb[102].mxu1 %vm950_vm1, %v2217_v12 }
 0x2ed   : > { %v2218_v27 = vmax.f32 %v2060_v25, 0.0  ;;  %v4415_v29 = vpop.f32.mrb[106].mxu0 }
 0x2ee   : > { %3318 = vst.msk [vmem:[%s5472_s11 + $0x148] sm:$0xff] %vm950_vm1, %v2219_v26  ;;  %v2075_v30 = vadd.f32 %v4415_v29, %v5465_v28  ;;  %v2069_v31 = vpop.f32.mrb[107].mxu0 }
 0x2ef   : > { %3317 = vst.msk [vmem:[%s5472_s11 + $0x140] sm:$0xff] %vm950_vm1, %v2218_v27  ;;  %v2070_v21 = vadd.f32 %v5465_v28, %v2069_v31  ;;  %4514 = vmatprep.mubr.msk.f32.mxu1 %vm950_vm1, %v2218_v27 }
 0x2f0   : > { %v2221_v32 = vmax.f32 %v2075_v30, 0.0  ;;  %4515 = vmatmul.mubr.msk.f32.gmra.mrb[104].mxu1 %vm950_vm1, %v2219_v26 }
 0x2f1   : > { %v2220_v33 = vmax.f32 %v2070_v21, 0.0  ;;  %v4418_v34 = vpop.f32.mrb[108].mxu0  ;;  %v5732_v21 = vld [vmem:[%s5938_s1 + $0x3] ss:$0 sm:$0xff] }
 0x2f2   : > { %3320 = vst.msk [vmem:[%s5472_s11 + $0x158] sm:$0xff] %vm950_vm1, %v2221_v32  ;;  %v2085_v35 = vadd.f32 %v4418_v34, %v5465_v28  ;;  %v2079_v36 = vpop.f32.mrb[109].mxu0 }
 0x2f3   : > { %3319 = vst.msk [vmem:[%s5472_s11 + $0x150] sm:$0xff] %vm950_vm1, %v2220_v33  ;;  %v2080_v37 = vadd.f32 %v5465_v28, %v2079_v36  ;;  %4517 = vmatprep.mubr.msk.f32.mxu1 %vm950_vm1, %v2220_v33 }
 0x2f4   : > { %v2223_v38 = vmax.f32 %v2085_v35, 0.0  ;;  %4518 = vmatmul.mubr.msk.f32.gmra.mrb[106].mxu1 %vm950_vm1, %v2221_v32 }
 0x2f5   : > { %v2222_v39 = vmax.f32 %v2080_v37, 0.0  ;;  %v4421_v40 = vpop.f32.mrb[110].mxu0 }
 0x2f6   : > { %3322 = vst.msk [vmem:[%s5472_s11 + $0x168] sm:$0xff] %vm950_vm1, %v2223_v38  ;;  %v2095_v41 = vadd.f32 %v4421_v40, %v5465_v28  ;;  %v2089_v42 = vpop.f32.mrb[111].mxu0 }
 0x2f7   : > { %3321 = vst.msk [vmem:[%s5472_s11 + $0x160] sm:$0xff] %vm950_vm1, %v2222_v39  ;;  %v2090_v43 = vadd.f32 %v5465_v28, %v2089_v42  ;;  %4520 = vmatprep.mubr.msk.f32.mxu1 %vm950_vm1, %v2222_v39 }
 0x2f8   : > { %v2225_v44 = vmax.f32 %v2095_v41, 0.0  ;;  %4521 = vmatmul.mubr.msk.f32.gmra.mrb[108].mxu1 %vm950_vm1, %v2223_v38 }
 0x2f9   : > { %v2224_v45 = vmax.f32 %v2090_v43, 0.0  ;;  %v4424_v46 = vpop.f32.mrb[112].mxu0 }
 0x2fa   : > { %3324 = vst.msk [vmem:[%s5472_s11 + $0x178] sm:$0xff] %vm950_vm1, %v2225_v44  ;;  %v2105_v47 = vadd.f32 %v4424_v46, %v5465_v28  ;;  %v2099_v48 = vpop.f32.mrb[113].mxu0 }
 0x2fb   : > { %3323 = vst.msk [vmem:[%s5472_s11 + $0x170] sm:$0xff] %vm950_vm1, %v2224_v45  ;;  %v2100_v49 = vadd.f32 %v5465_v28, %v2099_v48  ;;  %4523 = vmatprep.mubr.msk.f32.mxu1 %vm950_vm1, %v2224_v45 }
 0x2fc   : > { %v2227_v50 = vmax.f32 %v2105_v47, 0.0  ;;  %4524 = vmatmul.mubr.msk.f32.gmra.mrb[110].mxu1 %vm950_vm1, %v2225_v44 }
 0x2fd   : > { %v2226_v51 = vmax.f32 %v2100_v49, 0.0  ;;  %v4427_v52 = vpop.f32.mrb[114].mxu0 }
 0x2fe   : > { %3326 = vst.msk [vmem:[%s5472_s11 + $0x188] sm:$0xff] %vm950_vm1, %v2227_v50  ;;  %v2115_v53 = vadd.f32 %v4427_v52, %v5465_v28  ;;  %v2109_v54 = vpop.f32.mrb[115].mxu0 }
 0x2ff   : > { %3325 = vst.msk [vmem:[%s5472_s11 + $0x180] sm:$0xff] %vm950_vm1, %v2226_v51  ;;  %v2110_v55 = vadd.f32 %v5465_v28, %v2109_v54  ;;  %4526 = vmatprep.mubr.msk.f32.mxu1 %vm950_vm1, %v2226_v51 }
 0x300   : > { %v2229_v56 = vmax.f32 %v2115_v53, 0.0  ;;  %4527 = vmatmul.mubr.msk.f32.gmra.mrb[112].mxu1 %vm950_vm1, %v2227_v50 }
 0x301   : > { %v2228_v57 = vmax.f32 %v2110_v55, 0.0  ;;  %v4430_v58 = vpop.f32.mrb[116].mxu0 }
 0x302   : > { %3328 = vst.msk [vmem:[%s5472_s11 + $0x198] sm:$0xff] %vm950_vm1, %v2229_v56  ;;  %v2125_v59 = vadd.f32 %v4430_v58, %v5465_v28  ;;  %v2119_v60 = vpop.f32.mrb[117].mxu0 }
 0x303   : > { %3327 = vst.msk [vmem:[%s5472_s11 + $0x190] sm:$0xff] %vm950_vm1, %v2228_v57  ;;  %v2120_v61 = vadd.f32 %v5465_v28, %v2119_v60  ;;  %4529 = vmatprep.mubr.msk.f32.mxu1 %vm950_vm1, %v2228_v57 }
 0x304   : > { %v2231_v62 = vmax.f32 %v2125_v59, 0.0  ;;  %4530 = vmatmul.mubr.msk.f32.gmra.mrb[114].mxu1 %vm950_vm1, %v2229_v56 }
 0x305   : > { %v2230_v63 = vmax.f32 %v2120_v61, 0.0  ;;  %v4433_v0 = vpop.f32.mrb[118].mxu0 }
 0x306   : > { %3330 = vst.msk [vmem:[%s5472_s11 + $0x1a8] sm:$0xff] %vm950_vm1, %v2231_v62  ;;  %v2135_v1 = vadd.f32 %v4433_v0, %v5465_v28  ;;  %v2129_v2 = vpop.f32.mrb[119].mxu0 }
 0x307   : > { %3329 = vst.msk [vmem:[%s5472_s11 + $0x1a0] sm:$0xff] %vm950_vm1, %v2230_v63  ;;  %v2130_v3 = vadd.f32 %v5465_v28, %v2129_v2  ;;  %4532 = vmatprep.mubr.msk.f32.mxu1 %vm950_vm1, %v2230_v63 }
 0x308   : > { %v2233_v4 = vmax.f32 %v2135_v1, 0.0  ;;  %4533 = vmatmul.mubr.msk.f32.gmra.mrb[116].mxu1 %vm950_vm1, %v2231_v62 }
 0x309   : > { %v2232_v5 = vmax.f32 %v2130_v3, 0.0  ;;  %v4436_v6 = vpop.f32.mrb[120].mxu0 }
 0x30a   : > { %3332 = vst.msk [vmem:[%s5472_s11 + $0x1b8] sm:$0xff] %vm950_vm1, %v2233_v4  ;;  %v2145_v7 = vadd.f32 %v4436_v6, %v5465_v28  ;;  %v2139_v8 = vpop.f32.mrb[121].mxu0 }
 0x30b   : > { %3331 = vst.msk [vmem:[%s5472_s11 + $0x1b0] sm:$0xff] %vm950_vm1, %v2232_v5  ;;  %v2140_v9 = vadd.f32 %v5465_v28, %v2139_v8  ;;  %4535 = vmatprep.mubr.msk.f32.mxu1 %vm950_vm1, %v2232_v5 }
 0x30c   : > { %v2235_v10 = vmax.f32 %v2145_v7, 0.0  ;;  %4536 = vmatmul.mubr.msk.f32.gmra.mrb[118].mxu1 %vm950_vm1, %v2233_v4 }
 0x30d   : > { %v2234_v11 = vmax.f32 %v2140_v9, 0.0  ;;  %v4439_v13 = vpop.f32.mrb[122].mxu0 }
 0x30e   : > { %3334 = vst.msk [vmem:[%s5472_s11 + $0x1c8] sm:$0xff] %vm950_vm1, %v2235_v10  ;;  %v2155_v14 = vadd.f32 %v4439_v13, %v5465_v28  ;;  %v2149_v15 = vpop.f32.mrb[123].mxu0 }
 0x30f   : > { %3333 = vst.msk [vmem:[%s5472_s11 + $0x1c0] sm:$0xff] %vm950_vm1, %v2234_v11  ;;  %v2150_v16 = vadd.f32 %v5465_v28, %v2149_v15  ;;  %4538 = vmatprep.mubr.msk.f32.mxu1 %vm950_vm1, %v2234_v11 }
 0x310   : > { %v2237_v17 = vmax.f32 %v2155_v14, 0.0  ;;  %4539 = vmatmul.mubr.msk.f32.gmra.mrb[120].mxu1 %vm950_vm1, %v2235_v10 }
 0x311   : > { %v2236_v18 = vmax.f32 %v2150_v16, 0.0  ;;  %v4442_v19 = vpop.f32.mrb[124].mxu0 }
 0x312   : > { %3336 = vst.msk [vmem:[%s5472_s11 + $0x1d8] sm:$0xff] %vm950_vm1, %v2237_v17  ;;  %v2165_v12 = vadd.f32 %v4442_v19, %v5465_v28  ;;  %v2159_v20 = vpop.f32.mrb[125].mxu0 }
 0x313   : > { %3335 = vst.msk [vmem:[%s5472_s11 + $0x1d0] sm:$0xff] %vm950_vm1, %v2236_v18  ;;  %v2160_v22 = vadd.f32 %v5465_v28, %v2159_v20  ;;  %4541 = vmatprep.mubr.msk.f32.mxu1 %vm950_vm1, %v2236_v18 }
 0x314   : > { %v2239_v23 = vmax.f32 %v2165_v12, 0.0  ;;  %4542 = vmatmul.mubr.msk.f32.gmra.mrb[122].mxu1 %vm950_vm1, %v2237_v17 }
 0x315   : > { %v2238_v24 = vmax.f32 %v2160_v22, 0.0  ;;  %v4445_v25 = vpop.f32.mrb[126].mxu0 }
 0x316   : > { %3338 = vst.msk [vmem:[%s5472_s11 + $0x1e8] sm:$0xff] %vm950_vm1, %v2239_v23  ;;  %v2175_v26 = vadd.f32 %v4445_v25, %v5465_v28  ;;  %v2169_v27 = vpop.f32.mrb[127].mxu0 }
 0x317   : > { %3337 = vst.msk [vmem:[%s5472_s11 + $0x1e0] sm:$0xff] %vm950_vm1, %v2238_v24  ;;  %v2170_v29 = vadd.f32 %v5465_v28, %v2169_v27  ;;  %4544 = vmatprep.mubr.msk.f32.mxu1 %vm950_vm1, %v2238_v24 }
 0x318   : > { %v2241_v30 = vmax.f32 %v2175_v26, 0.0  ;;  %4545 = vmatmul.mubr.msk.f32.gmra.mrb[124].mxu1 %vm950_vm1, %v2239_v23 }
 0x319   : > { %v2240_v31 = vmax.f32 %v2170_v29, 0.0 }
 0x31a   : > { %3340 = vst.msk [vmem:[%s5472_s11 + $0x1f8] sm:$0xff] %vm950_vm1, %v2241_v30 }
 0x31b   : > { %3339 = vst.msk [vmem:[%s5472_s11 + $0x1f0] sm:$0xff] %vm950_vm1, %v2240_v31  ;;  %4547 = vmatprep.mubr.msk.f32.mxu1 %vm950_vm1, %v2240_v31 }
 0x31c   : > { %4548 = vmatmul.mubr.msk.f32.gmra.mrb[126].mxu1 %vm950_vm1, %v2241_v30 }
 0x373   : > { %v4456_v28 = vpop.f32.mrb[64].mxu1 }
 0x374   : > { %v2515_v32 = vadd.f32 %v4456_v28, %v5732_v21  ;;  %v2509_v33 = vpop.f32.mrb[65].mxu1 }
 0x375   : > { %v2510_v34 = vadd.f32 %v5732_v21, %v2509_v33 }
 0x376   : > { %v3803_v35 = vmul.f32 -1.442695, %v2515_v32 }
 0x377   : > { %v3802_v36 = vmul.f32 -1.442695, %v2510_v34  ;;  %v4459_v37 = vpop.f32.mrb[66].mxu1 }
 0x378   : > { %4586 = vpow2.f32 %v3803_v35  ;;  %v2525_v38 = vadd.f32 %v4459_v37, %v5732_v21  ;;  %v2519_v39 = vpop.f32.mrb[67].mxu1 }
 0x379   : > { %4588 = vpow2.f32 %v3802_v36  ;;  %v2520_v40 = vadd.f32 %v5732_v21, %v2519_v39 }
 0x37a   : > { %v3805_v41 = vmul.f32 -1.442695, %v2525_v38 }
 0x37b   : > { %v3804_v42 = vmul.f32 -1.442695, %v2520_v40  ;;  %v4462_v43 = vpop.f32.mrb[68].mxu1 }
 0x37c   : > { %4590 = vpow2.f32 %v3805_v41  ;;  %v2535_v44 = vadd.f32 %v4462_v43, %v5732_v21  ;;  %v2529_v45 = vpop.f32.mrb[69].mxu1 }
 0x37d   : > { %4592 = vpow2.f32 %v3804_v42  ;;  %v2530_v46 = vadd.f32 %v5732_v21, %v2529_v45 }
 0x37e   : > { %v3807_v47 = vmul.f32 -1.442695, %v2535_v44 }
 0x37f   : > { %v3806_v48 = vmul.f32 -1.442695, %v2530_v46  ;;  %v4465_v49 = vpop.f32.mrb[70].mxu1 }
 0x380   : > { %4594 = vpow2.f32 %v3807_v47  ;;  %v2545_v50 = vadd.f32 %v4465_v49, %v5732_v21  ;;  %v2539_v51 = vpop.f32.mrb[71].mxu1 }
 0x381   : > { %4596 = vpow2.f32 %v3806_v48  ;;  %v2540_v52 = vadd.f32 %v5732_v21, %v2539_v51 }
 0x382   : > { %v4587_v53 = vpop.eup %4586  ;;  %v3809_v54 = vmul.f32 -1.442695, %v2545_v50 }
 0x383   : > { %v4589_v55 = vpop.eup %4588  ;;  %v3021_v56 = vadd.f32 1.0, %v4587_v53  ;;  %v3808_v57 = vmul.f32 -1.442695, %v2540_v52  ;;  %v4468_v58 = vpop.f32.mrb[72].mxu1 }
 0x384   : > { %v3020_v59 = vadd.f32 1.0, %v4589_v55  ;;  %4598 = vpow2.f32 %v3809_v54  ;;  %v2555_v60 = vadd.f32 %v4468_v58, %v5732_v21  ;;  %v2549_v61 = vpop.f32.mrb[73].mxu1 }
 0x385   : > { %4600 = vrcp.f32 %v3021_v56  ;;  %v2550_v62 = vadd.f32 %v5732_v21, %v2549_v61 }
 0x386   : > { %v4591_v63 = vpop.eup %4590  ;;  %4602 = vrcp.f32 %v3020_v59  ;;  %v3811_v0 = vmul.f32 -1.442695, %v2555_v60 }
 0x387   : > { %v4593_v1 = vpop.eup %4592  ;;  %v3023_v2 = vadd.f32 1.0, %v4591_v63  ;;  %4604 = vpow2.f32 %v3808_v57  ;;  %v3810_v3 = vmul.f32 -1.442695, %v2550_v62  ;;  %v4471_v4 = vpop.f32.mrb[74].mxu1 }
 0x388   : > { %v3022_v5 = vadd.f32 1.0, %v4593_v1  ;;  %4606 = vpow2.f32 %v3811_v0  ;;  %v2565_v6 = vadd.f32 %v4471_v4, %v5732_v21  ;;  %v2559_v7 = vpop.f32.mrb[75].mxu1 }
 0x389   : > { %4608 = vrcp.f32 %v3023_v2  ;;  %v2560_v8 = vadd.f32 %v5732_v21, %v2559_v7 }
 0x38a   : > { %v4595_v9 = vpop.eup %4594  ;;  %4610 = vrcp.f32 %v3022_v5  ;;  %v3813_v10 = vmul.f32 -1.442695, %v2565_v6 }
 0x38b   : > { %v4597_v11 = vpop.eup %4596  ;;  %v3025_v13 = vadd.f32 1.0, %v4595_v9  ;;  %4612 = vpow2.f32 %v3810_v3  ;;  %v3812_v14 = vmul.f32 -1.442695, %v2560_v8  ;;  %v4474_v15 = vpop.f32.mrb[76].mxu1 }
 0x38c   : > { %v3024_v16 = vadd.f32 1.0, %v4597_v11  ;;  %4614 = vpow2.f32 %v3813_v10  ;;  %v2575_v17 = vadd.f32 %v4474_v15, %v5732_v21  ;;  %v2569_v18 = vpop.f32.mrb[77].mxu1 }
 0x38d   : > { %4616 = vrcp.f32 %v3025_v13  ;;  %v2570_v19 = vadd.f32 %v5732_v21, %v2569_v18 }
 0x38e   : > { %v4599_v12 = vpop.eup %4598  ;;  %4618 = vrcp.f32 %v3024_v16  ;;  %v3815_v20 = vmul.f32 -1.442695, %v2575_v17 }
 0x38f   : > { %v4601_v22 = vpop.eup %4600  ;;  %v3027_v23 = vadd.f32 1.0, %v4599_v12  ;;  %4620 = vpow2.f32 %v3812_v14  ;;  %v3814_v24 = vmul.f32 -1.442695, %v2570_v19  ;;  %v4477_v25 = vpop.f32.mrb[78].mxu1 }
 0x390   : > { %v4603_v26 = vpop.eup %4602  ;;  %3214 = vst.msk [vmem:[%s5751_s17 + $0x8] sm:$0xff] %vm3212_vm2, %v4601_v22  ;;  %4622 = vpow2.f32 %v3815_v20  ;;  %v2585_v27 = vadd.f32 %v4477_v25, %v5732_v21  ;;  %v2579_v29 = vpop.f32.mrb[79].mxu1 }
 0x391   : > { %v4605_v30 = vpop.eup %4604  ;;  %3213 = vst.msk [vmem:[%s5751_s17] sm:$0xff] %vm3212_vm2, %v4603_v26  ;;  %4624 = vrcp.f32 %v3027_v23  ;;  %v2580_v31 = vadd.f32 %v5732_v21, %v2579_v29 }
 0x392   : > { %v4607_v28 = vpop.eup %4606  ;;  %v3026_v32 = vadd.f32 1.0, %v4605_v30  ;;  %4626 = vpow2.f32 %v3814_v24  ;;  %v3817_v33 = vmul.f32 -1.442695, %v2585_v27 }
 0x393   : > { %v4609_v34 = vpop.eup %4608  ;;  %v3029_v35 = vadd.f32 1.0, %v4607_v28  ;;  %v3816_v36 = vmul.f32 -1.442695, %v2580_v31  ;;  %v4480_v37 = vpop.f32.mrb[80].mxu1 }
 0x394   : > { %v4611_v38 = vpop.eup %4610  ;;  %3216 = vst.msk [vmem:[%s5751_s17 + $0x18] sm:$0xff] %vm3212_vm2, %v4609_v34  ;;  %4628 = vrcp.f32 %v3026_v32  ;;  %v2595_v39 = vadd.f32 %v4480_v37, %v5732_v21  ;;  %v2589_v40 = vpop.f32.mrb[81].mxu1 }
 0x395   : > { %v4613_v41 = vpop.eup %4612  ;;  %3215 = vst.msk [vmem:[%s5751_s17 + $0x10] sm:$0xff] %vm3212_vm2, %v4611_v38  ;;  %4630 = vrcp.f32 %v3029_v35  ;;  %v2590_v42 = vadd.f32 %v5732_v21, %v2589_v40 }
 0x396   : > { %v4615_v43 = vpop.eup %4614  ;;  %v3028_v44 = vadd.f32 1.0, %v4613_v41  ;;  %4632 = vpow2.f32 %v3817_v33  ;;  %v3819_v45 = vmul.f32 -1.442695, %v2595_v39 }
 0x397   : > { %v4617_v46 = vpop.eup %4616  ;;  %v3031_v47 = vadd.f32 1.0, %v4615_v43  ;;  %4634 = vpow2.f32 %v3816_v36  ;;  %v3818_v48 = vmul.f32 -1.442695, %v2590_v42  ;;  %v4483_v49 = vpop.f32.mrb[82].mxu1 }
 0x398   : > { %v4619_v50 = vpop.eup %4618  ;;  %3218 = vst.msk [vmem:[%s5751_s17 + $0x28] sm:$0xff] %vm3212_vm2, %v4617_v46  ;;  %4636 = vrcp.f32 %v3028_v44  ;;  %v2605_v51 = vadd.f32 %v4483_v49, %v5732_v21  ;;  %v2599_v52 = vpop.f32.mrb[83].mxu1 }
 0x399   : > { %v4621_v53 = vpop.eup %4620  ;;  %3217 = vst.msk [vmem:[%s5751_s17 + $0x20] sm:$0xff] %vm3212_vm2, %v4619_v50  ;;  %4638 = vrcp.f32 %v3031_v47  ;;  %v2600_v54 = vadd.f32 %v5732_v21, %v2599_v52 }
 0x39a   : > { %v4623_v55 = vpop.eup %4622  ;;  %v3030_v56 = vadd.f32 1.0, %v4621_v53  ;;  %4640 = vpow2.f32 %v3819_v45  ;;  %v3821_v57 = vmul.f32 -1.442695, %v2605_v51 }
 0x39b   : > { %v4625_v58 = vpop.eup %4624  ;;  %v3033_v59 = vadd.f32 1.0, %v4623_v55  ;;  %4642 = vpow2.f32 %v3818_v48  ;;  %v4486_v60 = vpop.f32.mrb[84].mxu1  ;;  %v3820_v62 = vmul.f32 -1.442695, %v2600_v54 }
 0x39c   : > { %v4627_v61 = vpop.eup %4626  ;;  %3220 = vst.msk [vmem:[%s5751_s17 + $0x38] sm:$0xff] %vm3212_vm2, %v4625_v58  ;;  %4644 = vrcp.f32 %v3030_v56  ;;  %v2615_v63 = vadd.f32 %v4486_v60, %v5732_v21  ;;  %v2609_v0 = vpop.f32.mrb[85].mxu1 }
 0x39d   : > { %4646 = vrcp.f32 %v3033_v59  ;;  %v3032_v1 = vadd.f32 1.0, %v4627_v61  ;;  %v2610_v2 = vadd.f32 %v5732_v21, %v2609_v0 }
 0x39e   : > { %v4629_v3 = vpop.eup %4628  ;;  %4648 = vpow2.f32 %v3821_v57  ;;  %v3823_v4 = vmul.f32 -1.442695, %v2615_v63 }
 0x39f   : > { %v4631_v5 = vpop.eup %4630  ;;  %3219 = vst.msk [vmem:[%s5751_s17 + $0x30] sm:$0xff] %vm3212_vm2, %v4629_v3  ;;  %4650 = vrcp.f32 %v3032_v1  ;;  %v3822_v6 = vmul.f32 -1.442695, %v2610_v2  ;;  %v4489_v7 = vpop.f32.mrb[86].mxu1 }
 0x3a0   : > { %v4633_v8 = vpop.eup %4632  ;;  %3222 = vst.msk [vmem:[%s5751_s17 + $0x48] sm:$0xff] %vm3212_vm2, %v4631_v5  ;;  %4652 = vpow2.f32 %v3820_v62  ;;  %v2625_v9 = vadd.f32 %v4489_v7, %v5732_v21  ;;  %v2619_v10 = vpop.f32.mrb[87].mxu1 }
 0x3a1   : > { %v4635_v11 = vpop.eup %4634  ;;  %v3035_v13 = vadd.f32 1.0, %v4633_v8  ;;  %4654 = vpow2.f32 %v3823_v4  ;;  %v2620_v14 = vadd.f32 %v5732_v21, %v2619_v10 }
 0x3a2   : > { %v4637_v15 = vpop.eup %4636  ;;  %v3034_v16 = vadd.f32 1.0, %v4635_v11  ;;  %4656 = vpow2.f32 %v3822_v6  ;;  %v3825_v17 = vmul.f32 -1.442695, %v2625_v9 }
 0x3a3   : > { %v4639_v18 = vpop.eup %4638  ;;  %3221 = vst.msk [vmem:[%s5751_s17 + $0x40] sm:$0xff] %vm3212_vm2, %v4637_v15  ;;  %4658 = vrcp.f32 %v3035_v13  ;;  %v3824_v19 = vmul.f32 -1.442695, %v2620_v14  ;;  %v4492_v12 = vpop.f32.mrb[88].mxu1 }
 0x3a4   : > { %v4641_v20 = vpop.eup %4640  ;;  %3224 = vst.msk [vmem:[%s5751_s17 + $0x58] sm:$0xff] %vm3212_vm2, %v4639_v18  ;;  %4660 = vrcp.f32 %v3034_v16  ;;  %v2635_v22 = vadd.f32 %v4492_v12, %v5732_v21  ;;  %v2629_v23 = vpop.f32.mrb[89].mxu1 }
 0x3a5   : > { %v4643_v24 = vpop.eup %4642  ;;  %v3037_v25 = vadd.f32 1.0, %v4641_v20  ;;  %4662 = vpow2.f32 %v3825_v17  ;;  %v2630_v26 = vadd.f32 %v5732_v21, %v2629_v23 }
 0x3a6   : > { %v4645_v27 = vpop.eup %4644  ;;  %v3036_v29 = vadd.f32 1.0, %v4643_v24  ;;  %4664 = vpow2.f32 %v3824_v19  ;;  %v3827_v30 = vmul.f32 -1.442695, %v2635_v22 }
 0x3a7   : > { %v4647_v31 = vpop.eup %4646  ;;  %3223 = vst.msk [vmem:[%s5751_s17 + $0x50] sm:$0xff] %vm3212_vm2, %v4645_v27  ;;  %4666 = vrcp.f32 %v3037_v25  ;;  %v3826_v28 = vmul.f32 -1.442695, %v2630_v26  ;;  %v4495_v32 = vpop.f32.mrb[90].mxu1 }
 0x3a8   : > { %v4649_v33 = vpop.eup %4648  ;;  %3226 = vst.msk [vmem:[%s5751_s17 + $0x68] sm:$0xff] %vm3212_vm2, %v4647_v31  ;;  %4668 = vrcp.f32 %v3036_v29  ;;  %v2645_v34 = vadd.f32 %v4495_v32, %v5732_v21  ;;  %v2639_v35 = vpop.f32.mrb[91].mxu1 }
 0x3a9   : > { %v4651_v36 = vpop.eup %4650  ;;  %v3039_v37 = vadd.f32 1.0, %v4649_v33  ;;  %4670 = vpow2.f32 %v3827_v30  ;;  %v2640_v38 = vadd.f32 %v5732_v21, %v2639_v35 }
 0x3aa   : > { %v4653_v39 = vpop.eup %4652  ;;  %3225 = vst.msk [vmem:[%s5751_s17 + $0x60] sm:$0xff] %vm3212_vm2, %v4651_v36  ;;  %4672 = vpow2.f32 %v3826_v28  ;;  %v3829_v40 = vmul.f32 -1.442695, %v2645_v34 }
 0x3ab   : > { %v4655_v41 = vpop.eup %4654  ;;  %4674 = vrcp.f32 %v3039_v37  ;;  %v3038_v42 = vadd.f32 1.0, %v4653_v39  ;;  %v4498_v43 = vpop.f32.mrb[92].mxu1  ;;  %v3828_v46 = vmul.f32 -1.442695, %v2640_v38 }
 0x3ac   : > { %v4657_v44 = vpop.eup %4656  ;;  %v3041_v45 = vadd.f32 1.0, %v4655_v41  ;;  %4676 = vpow2.f32 %v3829_v40  ;;  %v2655_v47 = vadd.f32 %v4498_v43, %v5732_v21  ;;  %v2649_v48 = vpop.f32.mrb[93].mxu1 }
 0x3ad   : > { %v4659_v49 = vpop.eup %4658  ;;  %4678 = vrcp.f32 %v3038_v42  ;;  %v3040_v50 = vadd.f32 1.0, %v4657_v44  ;;  %v2650_v51 = vadd.f32 %v5732_v21, %v2649_v48 }
 0x3ae   : > { %v4661_v52 = vpop.eup %4660  ;;  %3228 = vst.msk [vmem:[%s5751_s17 + $0x78] sm:$0xff] %vm3212_vm2, %v4659_v49  ;;  %4680 = vrcp.f32 %v3041_v45  ;;  %v3831_v53 = vmul.f32 -1.442695, %v2655_v47 }
 0x3af   : > { %v4663_v54 = vpop.eup %4662  ;;  %3227 = vst.msk [vmem:[%s5751_s17 + $0x70] sm:$0xff] %vm3212_vm2, %v4661_v52  ;;  %4682 = vrcp.f32 %v3040_v50  ;;  %v4501_v55 = vpop.f32.mrb[94].mxu1  ;;  %v3830_v58 = vmul.f32 -1.442695, %v2650_v51 }
 0x3b0   : > { %v4665_v56 = vpop.eup %4664  ;;  %v3043_v57 = vadd.f32 1.0, %v4663_v54  ;;  %4684 = vpow2.f32 %v3828_v46  ;;  %v2665_v59 = vadd.f32 %v4501_v55, %v5732_v21  ;;  %v2659_v60 = vpop.f32.mrb[95].mxu1 }
 0x3b1   : > { %v4667_v61 = vpop.eup %4666  ;;  %v3042_v62 = vadd.f32 1.0, %v4665_v56  ;;  %4686 = vpow2.f32 %v3831_v53  ;;  %v2660_v63 = vadd.f32 %v5732_v21, %v2659_v60 }
 0x3b2   : > { %v4669_v0 = vpop.eup %4668  ;;  %3230 = vst.msk [vmem:[%s5751_s17 + $0x88] sm:$0xff] %vm3212_vm2, %v4667_v61  ;;  %4688 = vrcp.f32 %v3043_v57  ;;  %v3833_v1 = vmul.f32 -1.442695, %v2665_v59 }
 0x3b3   : > { %v4671_v2 = vpop.eup %4670  ;;  %3229 = vst.msk [vmem:[%s5751_s17 + $0x80] sm:$0xff] %vm3212_vm2, %v4669_v0  ;;  %4690 = vrcp.f32 %v3042_v62  ;;  %v4504_v3 = vpop.f32.mrb[96].mxu1  ;;  %v3832_v6 = vmul.f32 -1.442695, %v2660_v63 }
 0x3b4   : > { %v4673_v4 = vpop.eup %4672  ;;  %v3045_v5 = vadd.f32 1.0, %v4671_v2  ;;  %4692 = vpow2.f32 %v3830_v58  ;;  %v2675_v7 = vadd.f32 %v4504_v3, %v5732_v21  ;;  %v2669_v8 = vpop.f32.mrb[97].mxu1 }
 0x3b5   : > { %v4675_v9 = vpop.eup %4674  ;;  %v3044_v10 = vadd.f32 1.0, %v4673_v4  ;;  %4694 = vpow2.f32 %v3833_v1  ;;  %v2670_v11 = vadd.f32 %v5732_v21, %v2669_v8 }
 0x3b6   : > { %v4677_v13 = vpop.eup %4676  ;;  %3232 = vst.msk [vmem:[%s5751_s17 + $0x98] sm:$0xff] %vm3212_vm2, %v4675_v9  ;;  %4696 = vrcp.f32 %v3045_v5  ;;  %v3835_v14 = vmul.f32 -1.442695, %v2675_v7 }
 0x3b7   : > { %v4679_v15 = vpop.eup %4678  ;;  %4698 = vrcp.f32 %v3044_v10  ;;  %v3047_v16 = vadd.f32 1.0, %v4677_v13  ;;  %v3834_v17 = vmul.f32 -1.442695, %v2670_v11  ;;  %v4507_v18 = vpop.f32.mrb[98].mxu1 }
 0x3b8   : > { %v4681_v19 = vpop.eup %4680  ;;  %3231 = vst.msk [vmem:[%s5751_s17 + $0x90] sm:$0xff] %vm3212_vm2, %v4679_v15  ;;  %4700 = vpow2.f32 %v3832_v6  ;;  %v2685_v12 = vadd.f32 %v4507_v18, %v5732_v21  ;;  %v2679_v20 = vpop.f32.mrb[99].mxu1 }
 0x3b9   : > { %v4683_v22 = vpop.eup %4682  ;;  %3234 = vst.msk [vmem:[%s5751_s17 + $0xa8] sm:$0xff] %vm3212_vm2, %v4681_v19  ;;  %4702 = vrcp.f32 %v3047_v16  ;;  %v2680_v23 = vadd.f32 %v5732_v21, %v2679_v20 }
 0x3ba   : > { %v4685_v24 = vpop.eup %4684  ;;  %3233 = vst.msk [vmem:[%s5751_s17 + $0xa0] sm:$0xff] %vm3212_vm2, %v4683_v22  ;;  %4704 = vpow2.f32 %v3835_v14  ;;  %v3837_v25 = vmul.f32 -1.442695, %v2685_v12 }
 0x3bb   : > { %v4687_v26 = vpop.eup %4686  ;;  %v3046_v27 = vadd.f32 1.0, %v4685_v24  ;;  %4706 = vpow2.f32 %v3834_v17  ;;  %v3836_v29 = vmul.f32 -1.442695, %v2680_v23  ;;  %v4510_v30 = vpop.f32.mrb[100].mxu1 }
 0x3bc   : > { %v4689_v31 = vpop.eup %4688  ;;  %v3049_v28 = vadd.f32 1.0, %v4687_v26  ;;  %4708 = vpow2.f32 %v3837_v25  ;;  %v2695_v32 = vadd.f32 %v4510_v30, %v5732_v21  ;;  %v2689_v33 = vpop.f32.mrb[101].mxu1 }
 0x3bd   : > { %v4691_v34 = vpop.eup %4690  ;;  %3236 = vst.msk [vmem:[%s5751_s17 + $0xb8] sm:$0xff] %vm3212_vm2, %v4689_v31  ;;  %4710 = vrcp.f32 %v3046_v27  ;;  %v2690_v35 = vadd.f32 %v5732_v21, %v2689_v33 }
 0x3be   : > { %v4693_v36 = vpop.eup %4692  ;;  %3235 = vst.msk [vmem:[%s5751_s17 + $0xb0] sm:$0xff] %vm3212_vm2, %v4691_v34  ;;  %4712 = vrcp.f32 %v3049_v28  ;;  %v3839_v37 = vmul.f32 -1.442695, %v2695_v32 }
 0x3bf   : > { %v4695_v38 = vpop.eup %4694  ;;  %v3048_v39 = vadd.f32 1.0, %v4693_v36  ;;  %4714 = vpow2.f32 %v3836_v29  ;;  %v3838_v40 = vmul.f32 -1.442695, %v2690_v35  ;;  %v4513_v41 = vpop.f32.mrb[102].mxu1 }
 0x3c0   : > { %v4697_v42 = vpop.eup %4696  ;;  %v3051_v43 = vadd.f32 1.0, %v4695_v38  ;;  %4716 = vpow2.f32 %v3839_v37  ;;  %v2705_v44 = vadd.f32 %v4513_v41, %v5732_v21  ;;  %v2699_v45 = vpop.f32.mrb[103].mxu1 }
 0x3c1   : > { %v4699_v46 = vpop.eup %4698  ;;  %3238 = vst.msk [vmem:[%s5751_s17 + $0xc8] sm:$0xff] %vm3212_vm2, %v4697_v42  ;;  %4718 = vrcp.f32 %v3048_v39  ;;  %v2700_v47 = vadd.f32 %v5732_v21, %v2699_v45 }
 0x3c2   : > { %v4701_v48 = vpop.eup %4700  ;;  %3237 = vst.msk [vmem:[%s5751_s17 + $0xc0] sm:$0xff] %vm3212_vm2, %v4699_v46  ;;  %4720 = vrcp.f32 %v3051_v43  ;;  %v3841_v49 = vmul.f32 -1.442695, %v2705_v44 }
 0x3c3   : > { %v4703_v50 = vpop.eup %4702  ;;  %v3050_v51 = vadd.f32 1.0, %v4701_v48  ;;  %4722 = vpow2.f32 %v3838_v40  ;;  %v3840_v52 = vmul.f32 -1.442695, %v2700_v47  ;;  %v4516_v53 = vpop.f32.mrb[104].mxu1 }
 0x3c4   : > { %v4705_v54 = vpop.eup %4704  ;;  %3240 = vst.msk [vmem:[%s5751_s17 + $0xd8] sm:$0xff] %vm3212_vm2, %v4703_v50  ;;  %4724 = vpow2.f32 %v3841_v49  ;;  %v2715_v55 = vadd.f32 %v4516_v53, %v5732_v21  ;;  %v2709_v56 = vpop.f32.mrb[105].mxu1 }
 0x3c5   : > { %v4707_v57 = vpop.eup %4706  ;;  %4726 = vrcp.f32 %v3050_v51  ;;  %v3053_v58 = vadd.f32 1.0, %v4705_v54  ;;  %v2710_v59 = vadd.f32 %v5732_v21, %v2709_v56 }
 0x3c6   : > { %v4709_v60 = vpop.eup %4708  ;;  %v3052_v61 = vadd.f32 1.0, %v4707_v57  ;;  %4728 = vpow2.f32 %v3840_v52  ;;  %v3843_v62 = vmul.f32 -1.442695, %v2715_v55 }
 0x3c7   : > { %v4711_v63 = vpop.eup %4710  ;;  %4730 = vrcp.f32 %v3053_v58  ;;  %v3055_v0 = vadd.f32 1.0, %v4709_v60  ;;  %v3842_v1 = vmul.f32 -1.442695, %v2710_v59  ;;  %v4519_v2 = vpop.f32.mrb[106].mxu1 }
 0x3c8   : > { %v4713_v3 = vpop.eup %4712  ;;  %3239 = vst.msk [vmem:[%s5751_s17 + $0xd0] sm:$0xff] %vm3212_vm2, %v4711_v63  ;;  %4732 = vrcp.f32 %v3052_v61  ;;  %v2725_v4 = vadd.f32 %v4519_v2, %v5732_v21  ;;  %v2719_v5 = vpop.f32.mrb[107].mxu1 }
 0x3c9   : > { %v4715_v6 = vpop.eup %4714  ;;  %3242 = vst.msk [vmem:[%s5751_s17 + $0xe8] sm:$0xff] %vm3212_vm2, %v4713_v3  ;;  %4734 = vrcp.f32 %v3055_v0  ;;  %v2720_v7 = vadd.f32 %v5732_v21, %v2719_v5 }
 0x3ca   : > { %v4717_v8 = vpop.eup %4716  ;;  %v3054_v9 = vadd.f32 1.0, %v4715_v6  ;;  %4736 = vpow2.f32 %v3843_v62  ;;  %v3845_v10 = vmul.f32 -1.442695, %v2725_v4 }
 0x3cb   : > { %v4719_v11 = vpop.eup %4718  ;;  %v3057_v13 = vadd.f32 1.0, %v4717_v8  ;;  %4738 = vpow2.f32 %v3842_v1  ;;  %v3844_v14 = vmul.f32 -1.442695, %v2720_v7  ;;  %v4522_v15 = vpop.f32.mrb[108].mxu1 }
 0x3cc   : > { %v4721_v16 = vpop.eup %4720  ;;  %3241 = vst.msk [vmem:[%s5751_s17 + $0xe0] sm:$0xff] %vm3212_vm2, %v4719_v11  ;;  %4740 = vrcp.f32 %v3054_v9  ;;  %v2735_v17 = vadd.f32 %v4522_v15, %v5732_v21  ;;  %v2729_v18 = vpop.f32.mrb[109].mxu1 }
 0x3cd   : > { %v4723_v19 = vpop.eup %4722  ;;  %3244 = vst.msk [vmem:[%s5751_s17 + $0xf8] sm:$0xff] %vm3212_vm2, %v4721_v16  ;;  %4742 = vrcp.f32 %v3057_v13  ;;  %v2730_v12 = vadd.f32 %v5732_v21, %v2729_v18 }
 0x3ce   : > { %v4725_v20 = vpop.eup %4724  ;;  %v3056_v22 = vadd.f32 1.0, %v4723_v19  ;;  %4744 = vpow2.f32 %v3845_v10  ;;  %v3847_v23 = vmul.f32 -1.442695, %v2735_v17 }
 0x3cf   : > { %v4727_v24 = vpop.eup %4726  ;;  %v3059_v25 = vadd.f32 1.0, %v4725_v20  ;;  %4746 = vpow2.f32 %v3844_v14  ;;  %v4525_v26 = vpop.f32.mrb[110].mxu1  ;;  %v3846_v29 = vmul.f32 -1.442695, %v2730_v12 }
 0x3d0   : > { %v4729_v27 = vpop.eup %4728  ;;  %3243 = vst.msk [vmem:[%s5751_s17 + $0xf0] sm:$0xff] %vm3212_vm2, %v4727_v24  ;;  %4748 = vrcp.f32 %v3056_v22  ;;  %v2745_v30 = vadd.f32 %v4525_v26, %v5732_v21  ;;  %v2739_v31 = vpop.f32.mrb[111].mxu1 }
 0x3d1   : > { %v4731_v28 = vpop.eup %4730  ;;  %4750 = vrcp.f32 %v3059_v25  ;;  %v3058_v32 = vadd.f32 1.0, %v4729_v27  ;;  %v2740_v33 = vadd.f32 %v5732_v21, %v2739_v31 }
 0x3d2   : > { %v4733_v34 = vpop.eup %4732  ;;  %3246 = vst.msk [vmem:[%s5751_s17 + $0x108] sm:$0xff] %vm3212_vm2, %v4731_v28  ;;  %4752 = vpow2.f32 %v3847_v23  ;;  %v3849_v35 = vmul.f32 -1.442695, %v2745_v30 }
 0x3d3   : > { %v4735_v36 = vpop.eup %4734  ;;  %3245 = vst.msk [vmem:[%s5751_s17 + $0x100] sm:$0xff] %vm3212_vm2, %v4733_v34  ;;  %4754 = vrcp.f32 %v3058_v32  ;;  %v3848_v37 = vmul.f32 -1.442695, %v2740_v33  ;;  %v4528_v38 = vpop.f32.mrb[112].mxu1 }
 0x3d4   : > { %v4737_v39 = vpop.eup %4736  ;;  %3248 = vst.msk [vmem:[%s5751_s17 + $0x118] sm:$0xff] %vm3212_vm2, %v4735_v36  ;;  %4756 = vpow2.f32 %v3846_v29  ;;  %v2755_v40 = vadd.f32 %v4528_v38, %v5732_v21  ;;  %v2749_v41 = vpop.f32.mrb[113].mxu1 }
 0x3d5   : > { %v4739_v42 = vpop.eup %4738  ;;  %v3061_v43 = vadd.f32 1.0, %v4737_v39  ;;  %4758 = vpow2.f32 %v3849_v35  ;;  %v2750_v44 = vadd.f32 %v5732_v21, %v2749_v41 }
 0x3d6   : > { %v4741_v45 = vpop.eup %4740  ;;  %v3060_v46 = vadd.f32 1.0, %v4739_v42  ;;  %4760 = vpow2.f32 %v3848_v37  ;;  %v3851_v47 = vmul.f32 -1.442695, %v2755_v40 }
 0x3d7   : > { %v4743_v48 = vpop.eup %4742  ;;  %3247 = vst.msk [vmem:[%s5751_s17 + $0x110] sm:$0xff] %vm3212_vm2, %v4741_v45  ;;  %4762 = vrcp.f32 %v3061_v43  ;;  %v3850_v49 = vmul.f32 -1.442695, %v2750_v44  ;;  %v4531_v50 = vpop.f32.mrb[114].mxu1 }
 0x3d8   : > { %v4745_v51 = vpop.eup %4744  ;;  %3250 = vst.msk [vmem:[%s5751_s17 + $0x128] sm:$0xff] %vm3212_vm2, %v4743_v48  ;;  %4764 = vrcp.f32 %v3060_v46  ;;  %v2765_v52 = vadd.f32 %v4531_v50, %v5732_v21  ;;  %v2759_v53 = vpop.f32.mrb[115].mxu1 }
 0x3d9   : > { %v4747_v54 = vpop.eup %4746  ;;  %v3063_v55 = vadd.f32 1.0, %v4745_v51  ;;  %4766 = vpow2.f32 %v3851_v47  ;;  %v2760_v56 = vadd.f32 %v5732_v21, %v2759_v53 }
 0x3da   : > { %v4749_v57 = vpop.eup %4748  ;;  %v3062_v58 = vadd.f32 1.0, %v4747_v54  ;;  %4768 = vpow2.f32 %v3850_v49  ;;  %v3853_v59 = vmul.f32 -1.442695, %v2765_v52 }
 0x3db   : > { %v4751_v60 = vpop.eup %4750  ;;  %3249 = vst.msk [vmem:[%s5751_s17 + $0x120] sm:$0xff] %vm3212_vm2, %v4749_v57  ;;  %4770 = vrcp.f32 %v3063_v55  ;;  %v3852_v61 = vmul.f32 -1.442695, %v2760_v56  ;;  %v4534_v62 = vpop.f32.mrb[116].mxu1 }
 0x3dc   : > { %v4753_v63 = vpop.eup %4752  ;;  %3252 = vst.msk [vmem:[%s5751_s17 + $0x138] sm:$0xff] %vm3212_vm2, %v4751_v60  ;;  %4772 = vrcp.f32 %v3062_v58  ;;  %v2775_v0 = vadd.f32 %v4534_v62, %v5732_v21  ;;  %v2769_v1 = vpop.f32.mrb[117].mxu1 }
 0x3dd   : > { %v4755_v2 = vpop.eup %4754  ;;  %v3065_v3 = vadd.f32 1.0, %v4753_v63  ;;  %4774 = vpow2.f32 %v3853_v59  ;;  %v2770_v4 = vadd.f32 %v5732_v21, %v2769_v1  ;;  %v4842_v1 = vld [vmem:[%s5938_s1 + $0x3] ss:$0 sm:$0xff] }
 0x3de   : > { %v4757_v5 = vpop.eup %4756  ;;  %3251 = vst.msk [vmem:[%s5751_s17 + $0x130] sm:$0xff] %vm3212_vm2, %v4755_v2  ;;  %4776 = vpow2.f32 %v3852_v61  ;;  %v3855_v6 = vmul.f32 -1.442695, %v2775_v0 }
 0x3df   : > { %v4759_v7 = vpop.eup %4758  ;;  %4778 = vrcp.f32 %v3065_v3  ;;  %v3064_v8 = vadd.f32 1.0, %v4757_v5  ;;  %v4537_v9 = vpop.f32.mrb[118].mxu1  ;;  %v3854_v13 = vmul.f32 -1.442695, %v2770_v4 }
 0x3e0   : > { %v4761_v10 = vpop.eup %4760  ;;  %v3067_v11 = vadd.f32 1.0, %v4759_v7  ;;  %4780 = vpow2.f32 %v3855_v6  ;;  %v2785_v14 = vadd.f32 %v4537_v9, %v5732_v21  ;;  %v2779_v15 = vpop.f32.mrb[119].mxu1 }
 0x3e1   : > { %v4763_v16 = vpop.eup %4762  ;;  %4782 = vrcp.f32 %v3064_v8  ;;  %v3066_v17 = vadd.f32 1.0, %v4761_v10  ;;  %v2780_v18 = vadd.f32 %v5732_v21, %v2779_v15 }
 0x3e2   : > { %v4765_v19 = vpop.eup %4764  ;;  %3254 = vst.msk [vmem:[%s5751_s17 + $0x148] sm:$0xff] %vm3212_vm2, %v4763_v16  ;;  %4784 = vrcp.f32 %v3067_v11  ;;  %v3857_v12 = vmul.f32 -1.442695, %v2785_v14 }
 0x3e3   : > { %v4767_v20 = vpop.eup %4766  ;;  %3253 = vst.msk [vmem:[%s5751_s17 + $0x140] sm:$0xff] %vm3212_vm2, %v4765_v19  ;;  %4786 = vrcp.f32 %v3066_v17  ;;  %v4540_v22 = vpop.f32.mrb[120].mxu1  ;;  %v3856_v25 = vmul.f32 -1.442695, %v2780_v18 }
 0x3e4   : > { %v4769_v23 = vpop.eup %4768  ;;  %v3069_v24 = vadd.f32 1.0, %v4767_v20  ;;  %4788 = vpow2.f32 %v3854_v13  ;;  %v2795_v26 = vadd.f32 %v4540_v22, %v5732_v21  ;;  %v2789_v27 = vpop.f32.mrb[121].mxu1 }
 0x3e5   : > { %v4771_v29 = vpop.eup %4770  ;;  %v3068_v30 = vadd.f32 1.0, %v4769_v23  ;;  %4790 = vpow2.f32 %v3857_v12  ;;  %v2790_v31 = vadd.f32 %v5732_v21, %v2789_v27 }
 0x3e6   : > { %v4773_v28 = vpop.eup %4772  ;;  %3256 = vst.msk [vmem:[%s5751_s17 + $0x158] sm:$0xff] %vm3212_vm2, %v4771_v29  ;;  %4792 = vrcp.f32 %v3069_v24  ;;  %v3859_v32 = vmul.f32 -1.442695, %v2795_v26 }
 0x3e7   : > { %v4775_v33 = vpop.eup %4774  ;;  %3255 = vst.msk [vmem:[%s5751_s17 + $0x150] sm:$0xff] %vm3212_vm2, %v4773_v28  ;;  %4794 = vrcp.f32 %v3068_v30  ;;  %v4543_v34 = vpop.f32.mrb[122].mxu1  ;;  %v3858_v37 = vmul.f32 -1.442695, %v2790_v31 }
 0x3e8   : > { %v4777_v35 = vpop.eup %4776  ;;  %v3071_v36 = vadd.f32 1.0, %v4775_v33  ;;  %4796 = vpow2.f32 %v3856_v25  ;;  %v2805_v38 = vadd.f32 %v4543_v34, %v5732_v21  ;;  %v2799_v39 = vpop.f32.mrb[123].mxu1 }
 0x3e9   : > { %v4779_v40 = vpop.eup %4778  ;;  %v3070_v41 = vadd.f32 1.0, %v4777_v35  ;;  %4798 = vpow2.f32 %v3859_v32  ;;  %v2800_v42 = vadd.f32 %v5732_v21, %v2799_v39 }
 0x3ea   : > { %v4781_v43 = vpop.eup %4780  ;;  %3258 = vst.msk [vmem:[%s5751_s17 + $0x168] sm:$0xff] %vm3212_vm2, %v4779_v40  ;;  %4800 = vrcp.f32 %v3071_v36  ;;  %v3861_v44 = vmul.f32 -1.442695, %v2805_v38 }
 0x3eb   : > { %v4783_v45 = vpop.eup %4782  ;;  %4802 = vrcp.f32 %v3070_v41  ;;  %v3073_v46 = vadd.f32 1.0, %v4781_v43  ;;  %v3860_v47 = vmul.f32 -1.442695, %v2800_v42  ;;  %v4546_v48 = vpop.f32.mrb[124].mxu1 }
 0x3ec   : > { %v4785_v49 = vpop.eup %4784  ;;  %3257 = vst.msk [vmem:[%s5751_s17 + $0x160] sm:$0xff] %vm3212_vm2, %v4783_v45  ;;  %4804 = vpow2.f32 %v3858_v37  ;;  %v2815_v50 = vadd.f32 %v4546_v48, %v5732_v21  ;;  %v2809_v51 = vpop.f32.mrb[125].mxu1 }
 0x3ed   : > { %v4787_v52 = vpop.eup %4786  ;;  %3260 = vst.msk [vmem:[%s5751_s17 + $0x178] sm:$0xff] %vm3212_vm2, %v4785_v49  ;;  %4806 = vrcp.f32 %v3073_v46  ;;  %v2810_v53 = vadd.f32 %v5732_v21, %v2809_v51 }
 0x3ee   : > { %v4789_v54 = vpop.eup %4788  ;;  %3259 = vst.msk [vmem:[%s5751_s17 + $0x170] sm:$0xff] %vm3212_vm2, %v4787_v52  ;;  %4808 = vpow2.f32 %v3861_v44  ;;  %v3863_v55 = vmul.f32 -1.442695, %v2815_v50 }
 0x3ef   : > { %v4791_v56 = vpop.eup %4790  ;;  %v3072_v57 = vadd.f32 1.0, %v4789_v54  ;;  %4810 = vpow2.f32 %v3860_v47  ;;  %v3862_v58 = vmul.f32 -1.442695, %v2810_v53  ;;  %v4549_v59 = vpop.f32.mrb[126].mxu1 }
 0x3f0   : > { %v4793_v60 = vpop.eup %4792  ;;  %v3075_v61 = vadd.f32 1.0, %v4791_v56  ;;  %4812 = vpow2.f32 %v3863_v55  ;;  %v2825_v62 = vadd.f32 %v4549_v59, %v5732_v21  ;;  %v2819_v63 = vpop.f32.mrb[127].mxu1 }
 0x3f1   : > { %v4795_v0 = vpop.eup %4794  ;;  %3262 = vst.msk [vmem:[%s5751_s17 + $0x188] sm:$0xff] %vm3212_vm2, %v4793_v60  ;;  %4814 = vrcp.f32 %v3072_v57  ;;  %v2820_v2 = vadd.f32 %v4842_v1, %v2819_v63 }
 0x3f2   : > { %v4797_v3 = vpop.eup %4796  ;;  %3261 = vst.msk [vmem:[%s5751_s17 + $0x180] sm:$0xff] %vm3212_vm2, %v4795_v0  ;;  %4816 = vrcp.f32 %v3075_v61  ;;  %v3865_v4 = vmul.f32 -1.442695, %v2825_v62 }
 0x3f3   : > { %v4799_v5 = vpop.eup %4798  ;;  %v3074_v6 = vadd.f32 1.0, %v4797_v3  ;;  %4818 = vpow2.f32 %v3862_v58  ;;  %v3864_v21 = vmul.f32 -1.442695, %v2820_v2 }
 0x3f4   : > { %v4801_v7 = vpop.eup %4800  ;;  %v3077_v8 = vadd.f32 1.0, %v4799_v5  ;;  %4820 = vpow2.f32 %v3865_v4 }
 0x3f5   : > { %v4803_v9 = vpop.eup %4802  ;;  %3264 = vst.msk [vmem:[%s5751_s17 + $0x198] sm:$0xff] %vm3212_vm2, %v4801_v7  ;;  %4822 = vrcp.f32 %v3074_v6 }
 0x3f6   : > { %v4805_v10 = vpop.eup %4804  ;;  %3263 = vst.msk [vmem:[%s5751_s17 + $0x190] sm:$0xff] %vm3212_vm2, %v4803_v9  ;;  %4824 = vrcp.f32 %v3077_v8 }
 0x3f7   : > { %v4807_v11 = vpop.eup %4806  ;;  %v3076_v13 = vadd.f32 1.0, %v4805_v10  ;;  %4826 = vpow2.f32 %v3864_v21 }
 0x3f8   : > { %v4809_v14 = vpop.eup %4808  ;;  %3266 = vst.msk [vmem:[%s5751_s17 + $0x1a8] sm:$0xff] %vm3212_vm2, %v4807_v11 }
 0x3f9   : > { %v4811_v15 = vpop.eup %4810  ;;  %4828 = vrcp.f32 %v3076_v13  ;;  %v3079_v16 = vadd.f32 1.0, %v4809_v14 }
 0x3fa   : > { %v4813_v17 = vpop.eup %4812  ;;  %v3078_v18 = vadd.f32 1.0, %v4811_v15 }
 0x3fb   : > { %v4815_v19 = vpop.eup %4814  ;;  %4830 = vrcp.f32 %v3079_v16  ;;  %v3081_v12 = vadd.f32 1.0, %v4813_v17 }
 0x3fc   : > { %v4817_v20 = vpop.eup %4816  ;;  %3265 = vst.msk [vmem:[%s5751_s17 + $0x1a0] sm:$0xff] %vm3212_vm2, %v4815_v19  ;;  %4832 = vrcp.f32 %v3078_v18 }
 0x3fd   : > { %v4819_v22 = vpop.eup %4818  ;;  %3268 = vst.msk [vmem:[%s5751_s17 + $0x1b8] sm:$0xff] %vm3212_vm2, %v4817_v20  ;;  %4834 = vrcp.f32 %v3081_v12 }
 0x3fe   : > { %v4821_v23 = vpop.eup %4820  ;;  %v3080_v24 = vadd.f32 1.0, %v4819_v22 }
 0x3ff   : > { %v4823_v25 = vpop.eup %4822  ;;  %v3083_v26 = vadd.f32 1.0, %v4821_v23 }
 0x400   : > { %v4825_v27 = vpop.eup %4824  ;;  %3267 = vst.msk [vmem:[%s5751_s17 + $0x1b0] sm:$0xff] %vm3212_vm2, %v4823_v25  ;;  %4836 = vrcp.f32 %v3080_v24 }
 0x401   : > { %v4827_v29 = vpop.eup %4826  ;;  %3270 = vst.msk [vmem:[%s5751_s17 + $0x1c8] sm:$0xff] %vm3212_vm2, %v4825_v27  ;;  %4838 = vrcp.f32 %v3083_v26 }
 0x402   : > { %v3082_v30 = vadd.f32 1.0, %v4827_v29 }
 0x403   : > { %v4829_v31 = vpop.eup %4828 }
 0x404   : > { %3269 = vst.msk [vmem:[%s5751_s17 + $0x1c0] sm:$0xff] %vm3212_vm2, %v4829_v31  ;;  %4840 = vrcp.f32 %v3082_v30 }
 0x405   : > { %v4831_v28 = vpop.eup %4830 }
 0x406   : > { %v4833_v32 = vpop.eup %4832  ;;  %3272 = vst.msk [vmem:[%s5751_s17 + $0x1d8] sm:$0xff] %vm3212_vm2, %v4831_v28 }
 0x407   : > { %v4835_v33 = vpop.eup %4834  ;;  %3271 = vst.msk [vmem:[%s5751_s17 + $0x1d0] sm:$0xff] %vm3212_vm2, %v4833_v32 }
 0x408   : > { %3274 = vst.msk [vmem:[%s5751_s17 + $0x1e8] sm:$0xff] %vm3212_vm2, %v4835_v33 }
 0x40a   : > { %v4837_v34 = vpop.eup %4836 }
 0x40b   : > { %v4839_v35 = vpop.eup %4838  ;;  %3273 = vst.msk [vmem:[%s5751_s17 + $0x1e0] sm:$0xff] %vm3212_vm2, %v4837_v34 }
 0x40c   : > { %3276 = vst.msk [vmem:[%s5751_s17 + $0x1f8] sm:$0xff] %vm3212_vm2, %v4839_v35 }
 0x40e   : > { %v4841_v36 = vpop.eup %4840 }
 0x40f   : > { %3275 = vst.msk [vmem:[%s5751_s17 + $0x1f0] sm:$0xff] %vm3212_vm2, %v4841_v36 }
 0x410 PF: > { %s15_s15 = sadd.s32 1, %s4849_s15  }
 0x411   : > { %p12_p4 = scmp.ge.s32.totalorder %s15_s15, 4  }
 0x413   :  { %14 = sbr.rel (!%p12_p4) target bundleno = 1 (0x1), region = 82 }

</bundles_post_ra>
